<compile_context>
chip_gen: v7x
topology: tpu7x:2x2x1
jax: 0.10.0
libtpu: 0.0.40
codegen_flags: <defaults>
</compile_context>

<pallas_src>
import functools

import jax
import jax.numpy as jnp
from jax import lax
from jax.experimental import pallas as pl
from jax.experimental.pallas import tpu as pltpu


# dot_general dims: lhs @ rhs^T (contract the last dim of both operands).
_NT = (((1,), (1,)), ((), ()))


def _mhsa_kernel(x_ref, wqkv_ref, bqkv_ref, pos_ref, o_ref, *, heads, d):
    """One batch element: fused QKV projection + per-head attention."""
    f32 = jnp.float32
    bf16 = jnp.bfloat16
    C = heads * d

    xb = x_ref[0]            # (N, C)   bf16 activations, channels last
    w = wqkv_ref[...]        # (C, 3C)  bf16 merged [Wq^T | Wk^T | Wv^T]
    b = bqkv_ref[...]        # (1, 3C)  f32  merged [bq | bk | bv]
    pos = pos_ref[...]       # (N, C)   bf16 rel_h + rel_w, head-blocked cols

    # 1x1 conv for ALL heads and q/k/v at once: lane-dense (N,C)@(C,3C).
    qkv = jnp.dot(xb, w, preferred_element_type=f32) + b       # (N, 3C) f32

    outs = []
    for h in range(heads):                       # heads is small & static
        lo, hi = h * d, (h + 1) * d
        q_h = qkv[:, lo:hi].astype(bf16)                        # (N, d)
        k_h = qkv[:, C + lo:C + hi].astype(bf16)                # (N, d)
        v_h = qkv[:, 2 * C + lo:2 * C + hi].astype(bf16)        # (N, d)
        pos_h = pos[:, lo:hi]                                   # (N, d) bf16

        # energy[i,j] = sum_c q[i,c]k[j,c] + sum_c pos[i,c]q[j,c]
        # fused as one NT matmul of contraction depth 2d.
        lhs = jnp.concatenate([q_h, pos_h], axis=-1)            # (N, 2d)
        rhs = jnp.concatenate([k_h, q_h], axis=-1)              # (N, 2d)
        energy = lax.dot_general(lhs, rhs, _NT,
                                 preferred_element_type=f32)    # (N, N)

        # row-wise softmax in f32 (keys on the lane axis)
        energy = energy - jnp.max(energy, axis=-1, keepdims=True)
        e = jnp.exp(energy)
        attn = e * pl.reciprocal(jnp.sum(e, axis=-1, keepdims=True),
                                 approx=True)                   # (N, N)

        # out[i,c] = sum_j attn[i,j] * v[j,c]
        outs.append(jnp.dot(attn.astype(bf16), v_h,
                            preferred_element_type=f32))        # (N, d)

    # Single lane-dense store of the full (N, C) tile.
    o_ref[0] = jnp.concatenate(outs, axis=-1).astype(o_ref.dtype)


def mhsa_forward(x_nchw, params, *, heads):
    """MHSA forward. x: (B, C, W, H) -> (B, C, W, H), matching the PyTorch module."""
    B, C, W, H = x_nchw.shape
    if C % heads:
        raise ValueError("n_dims must be divisible by heads")
    d = C // heads
    N = W * H
    f32, bf16 = jnp.float32, jnp.bfloat16

    # ---- layout staging (plain-JAX glue) ----
    # TODO(synk): the (B,C,N)->(B,N,C) transpose is an extra HBM round-trip of x;
    # fold it into the producing op if this module is used at large activations.
    x_nc = jnp.transpose(x_nchw.reshape(B, C, N), (0, 2, 1)).astype(bf16)   # (B,N,C)

    # Merged projection: columns are output channels, head h at cols h*d:(h+1)*d.
    wqkv = jnp.concatenate(
        [params["wq"].T, params["wk"].T, params["wv"].T], axis=-1).astype(bf16)  # (C,3C)
    bqkv = jnp.concatenate(
        [params["bq"], params["bk"], params["bv"]], axis=0).reshape(1, 3 * C).astype(f32)

    # (1,heads,d,1,H)+(1,heads,d,W,1) -> (heads,d,N) -> (N,heads,d) -> (N,C); n = w*H + h
    pos = jnp.transpose((params["rel_h"] + params["rel_w"]).reshape(heads, d, N),
                        (2, 0, 1)).reshape(N, C).astype(bf16)

    kernel = functools.partial(_mhsa_kernel, heads=heads, d=d)

    out_bnc = pl.pallas_call(
        kernel,
        out_shape=jax.ShapeDtypeStruct((B, N, C), f32),
        grid=(B,),
        in_specs=[
            pl.BlockSpec((1, N, C), lambda b: (b, 0, 0)),   # x: per-batch tile
            pl.BlockSpec((C, 3 * C), lambda b: (0, 0)),     # Wqkv: fetched once
            pl.BlockSpec((1, 3 * C), lambda b: (0, 0)),     # bqkv: fetched once
            pl.BlockSpec((N, C), lambda b: (0, 0)),         # rel pos: fetched once
        ],
        out_specs=pl.BlockSpec((1, N, C), lambda b: (b, 0, 0)),  # lane-dense out
        compiler_params=pltpu.CompilerParams(
            dimension_semantics=("parallel",),
            vmem_limit_bytes=32 * 1024 * 1024,
        ),
    )(x_nc, wqkv, bqkv, pos)

    # (B, N, C) -> (B, C, N) -> (B, C, W, H)
    return jnp.transpose(out_bnc, (0, 2, 1)).reshape(B, C, W, H)


# ----------------------------- parameters & reference -----------------------

def make_mhsa_params(key, n_dims, width, height, heads):
    d = n_dims // heads
    ks = jax.random.split(key, 8)
    s = 0.1
    return {
        "wq": s * jax.random.normal(ks[0], (n_dims, n_dims), jnp.float32),
        "wk": s * jax.random.normal(ks[1], (n_dims, n_dims), jnp.float32),
        "wv": s * jax.random.normal(ks[2], (n_dims, n_dims), jnp.float32),
        "bq": s * jax.random.normal(ks[3], (n_dims,), jnp.float32),
        "bk": s * jax.random.normal(ks[4], (n_dims,), jnp.float32),
        "bv": s * jax.random.normal(ks[5], (n_dims,), jnp.float32),
        "rel_h": s * jax.random.normal(ks[6], (1, heads, d, 1, height), jnp.float32),
        "rel_w": s * jax.random.normal(ks[7], (1, heads, d, width, 1), jnp.float32),
    }


def mhsa_reference(x, params, *, heads):
    """Pure-JAX mirror of the PyTorch forward (for correctness checking)."""
    B, C, W, H = x.shape
    d = C // heads
    N = W * H
    hp = jax.lax.Precision.HIGHEST

    def conv1x1(w, b):
        return jnp.einsum("oc,bcwh->bowh", w, x, precision=hp) + b[None, :, None, None]

    q = conv1x1(params["wq"], params["bq"]).reshape(B, heads, d, N)
    k = conv1x1(params["wk"], params["bk"]).reshape(B, heads, d, N)
    v = conv1x1(params["wv"], params["bv"]).reshape(B, heads, d, N)

    cc = jnp.einsum("bhdi,bhdj->bhij", q, k, precision=hp)
    pos = (params["rel_h"] + params["rel_w"]).reshape(heads, d, N)
    cp = jnp.einsum("hdi,bhdj->bhij", pos, q, precision=hp)
    attn = jax.nn.softmax(cc + cp, axis=-1)
    out = jnp.einsum("bhij,bhdj->bhdi", attn, v, precision=hp)
    return out.reshape(B, C, W, H)


# ------------------------------------ main -----------------------------------

if __name__ == "__main__":
    B, C, W, H, heads = 2, 32, 8, 8, 4            # n_dims=32, 8x8 spatial, 4 heads

    key = jax.random.PRNGKey(0)
    kx, kp = jax.random.split(key)
    x = jax.random.normal(kx, (B, C, W, H), dtype=jnp.float32)   # NCHW
    params = make_mhsa_params(kp, C, W, H, heads)

    fwd = jax.jit(functools.partial(mhsa_forward, heads=heads))
    out = jax.block_until_ready(fwd(x, params))

    assert out.shape == (B, C, W, H), out.shape
    assert out.dtype == jnp.float32
    assert bool(jnp.all(jnp.isfinite(out)))

    ref = mhsa_reference(x, params, heads=heads)
    max_err = float(jnp.max(jnp.abs(out - ref)))
    assert max_err < 5e-2, f"mismatch vs pure-JAX reference: {max_err}"

    print("KERNEL_OK")
</pallas_src>

<mosaic_0001>
module attributes {stable_mosaic.version = 11 : i64} {
  func.func @_mhsa_kernel(%arg0: i32, %arg1: memref<1x64x32xbf16, #tpu.memory_space<vmem>>, %arg2: memref<32x96xbf16, #tpu.memory_space<vmem>>, %arg3: memref<1x96xf32, #tpu.memory_space<vmem>>, %arg4: memref<64x32xbf16, #tpu.memory_space<vmem>>, %arg5: memref<1x64x32xf32, #tpu.memory_space<vmem>>) attributes {dimension_semantics = [#tpu.dimension_semantics<parallel>], iteration_bounds = array<i64: 2>, scalar_prefetch = 0 : i64, scratch_operands = 0 : i64, tpu.core_type = #tpu.core_type<tc>, window_params = [{transform_indices = @transform_0, window_bounds = array<i64: 1, 64, 32>}, {pipeline_mode = #tpu.pipeline_mode<synchronous>, transform_indices = @transform_1, window_bounds = array<i64: 32, 96>}, {pipeline_mode = #tpu.pipeline_mode<synchronous>, transform_indices = @transform_2, window_bounds = array<i64: 1, 96>}, {pipeline_mode = #tpu.pipeline_mode<synchronous>, transform_indices = @transform_3, window_bounds = array<i64: 64, 32>}, {transform_indices = @transform_4, window_bounds = array<i64: 1, 64, 32>}]} {
    %c0 = arith.constant 0 : index
    %c0_0 = arith.constant 0 : index
    %c0_1 = arith.constant 0 : index
    %0 = vector.load %arg1[%c0, %c0_0, %c0_1] : memref<1x64x32xbf16, #tpu.memory_space<vmem>>, vector<1x64x32xbf16>
    %1 = vector.shape_cast %0 : vector<1x64x32xbf16> to vector<64x32xbf16>
    %c0_2 = arith.constant 0 : index
    %c0_3 = arith.constant 0 : index
    %2 = vector.load %arg2[%c0_2, %c0_3] : memref<32x96xbf16, #tpu.memory_space<vmem>>, vector<32x96xbf16>
    %c0_4 = arith.constant 0 : index
    %c0_5 = arith.constant 0 : index
    %3 = vector.load %arg3[%c0_4, %c0_5] : memref<1x96xf32, #tpu.memory_space<vmem>>, vector<1x96xf32>
    %c0_6 = arith.constant 0 : index
    %c0_7 = arith.constant 0 : index
    %4 = vector.load %arg4[%c0_6, %c0_7] : memref<64x32xbf16, #tpu.memory_space<vmem>>, vector<64x32xbf16>
    %cst = arith.constant dense<0.000000e+00> : vector<64x96xf32>
    %5 = tpu.matmul %1, %2, %cst {dimension_numbers = #tpu.dot_dimension_numbers<[1], [0], [0], [1], [0, 0, 1, 1], [], []>} : vector<64x32xbf16>, vector<32x96xbf16>, vector<64x96xf32> -> vector<64x96xf32>
    %6 = vector.broadcast %3 : vector<1x96xf32> to vector<64x96xf32>
    %7 = arith.addf %5, %6 : vector<64x96xf32>
    %8 = vector.extract_strided_slice %7 {offsets = [0, 0], sizes = [64, 8], strides = [1, 1]} : vector<64x96xf32> to vector<64x8xf32>
    %9 = arith.truncf %8 : vector<64x8xf32> to vector<64x8xbf16>
    %10 = vector.extract_strided_slice %7 {offsets = [0, 32], sizes = [64, 8], strides = [1, 1]} : vector<64x96xf32> to vector<64x8xf32>
    %11 = arith.truncf %10 : vector<64x8xf32> to vector<64x8xbf16>
    %12 = vector.extract_strided_slice %7 {offsets = [0, 64], sizes = [64, 8], strides = [1, 1]} : vector<64x96xf32> to vector<64x8xf32>
    %13 = arith.truncf %12 : vector<64x8xf32> to vector<64x8xbf16>
    %14 = vector.extract_strided_slice %4 {offsets = [0, 0], sizes = [64, 8], strides = [1, 1]} : vector<64x32xbf16> to vector<64x8xbf16>
    %15 = tpu.concatenate %9, %14 in 1 : vector<64x8xbf16>, vector<64x8xbf16> -> vector<64x16xbf16>
    %16 = tpu.concatenate %11, %9 in 1 : vector<64x8xbf16>, vector<64x8xbf16> -> vector<64x16xbf16>
    %cst_8 = arith.constant dense<0.000000e+00> : vector<64x64xf32>
    %17 = tpu.matmul %15, %16, %cst_8 {dimension_numbers = #tpu.dot_dimension_numbers<[1], [1], [0], [0], [0, 0, 1, 0], [], []>} : vector<64x16xbf16>, vector<64x16xbf16>, vector<64x64xf32> -> vector<64x64xf32>
    %cst_9 = arith.constant dense<0xFF800000> : vector<64xf32>
    %18 = vector.multi_reduction <maximumf>, %17, %cst_9 [1] : vector<64x64xf32> to vector<64xf32>
    %19 = vector.shape_cast %18 : vector<64xf32> to vector<64x1xf32>
    %20 = vector.broadcast %19 : vector<64x1xf32> to vector<64x64xf32>
    %21 = arith.subf %17, %20 : vector<64x64xf32>
    %22 = math.exp %21 : vector<64x64xf32>
    %cst_10 = arith.constant dense<0.000000e+00> : vector<64xf32>
    %23 = vector.multi_reduction <add>, %22, %cst_10 [1] : vector<64x64xf32> to vector<64xf32>
    %24 = vector.shape_cast %23 : vector<64xf32> to vector<64x1xf32>
    %25 = tpu.reciprocal %24 {approx = true} : vector<64x1xf32> -> vector<64x1xf32>
    %26 = vector.broadcast %25 : vector<64x1xf32> to vector<64x64xf32>
    %27 = arith.mulf %22, %26 : vector<64x64xf32>
    %28 = arith.truncf %27 : vector<64x64xf32> to vector<64x64xbf16>
    %cst_11 = arith.constant dense<0.000000e+00> : vector<64x8xf32>
    %29 = tpu.matmul %28, %13, %cst_11 {dimension_numbers = #tpu.dot_dimension_numbers<[1], [0], [0], [1], [0, 0, 1, 1], [], []>} : vector<64x64xbf16>, vector<64x8xbf16>, vector<64x8xf32> -> vector<64x8xf32>
    %30 = vector.extract_strided_slice %7 {offsets = [0, 8], sizes = [64, 8], strides = [1, 1]} : vector<64x96xf32> to vector<64x8xf32>
    %31 = arith.truncf %30 : vector<64x8xf32> to vector<64x8xbf16>
    %32 = vector.extract_strided_slice %7 {offsets = [0, 40], sizes = [64, 8], strides = [1, 1]} : vector<64x96xf32> to vector<64x8xf32>
    %33 = arith.truncf %32 : vector<64x8xf32> to vector<64x8xbf16>
    %34 = vector.extract_strided_slice %7 {offsets = [0, 72], sizes = [64, 8], strides = [1, 1]} : vector<64x96xf32> to vector<64x8xf32>
    %35 = arith.truncf %34 : vector<64x8xf32> to vector<64x8xbf16>
    %36 = vector.extract_strided_slice %4 {offsets = [0, 8], sizes = [64, 8], strides = [1, 1]} : vector<64x32xbf16> to vector<64x8xbf16>
    %37 = tpu.concatenate %31, %36 in 1 : vector<64x8xbf16>, vector<64x8xbf16> -> vector<64x16xbf16>
    %38 = tpu.concatenate %33, %31 in 1 : vector<64x8xbf16>, vector<64x8xbf16> -> vector<64x16xbf16>
    %cst_12 = arith.constant dense<0.000000e+00> : vector<64x64xf32>
    %39 = tpu.matmul %37, %38, %cst_12 {dimension_numbers = #tpu.dot_dimension_numbers<[1], [1], [0], [0], [0, 0, 1, 0], [], []>} : vector<64x16xbf16>, vector<64x16xbf16>, vector<64x64xf32> -> vector<64x64xf32>
    %cst_13 = arith.constant dense<0xFF800000> : vector<64xf32>
    %40 = vector.multi_reduction <maximumf>, %39, %cst_13 [1] : vector<64x64xf32> to vector<64xf32>
    %41 = vector.shape_cast %40 : vector<64xf32> to vector<64x1xf32>
    %42 = vector.broadcast %41 : vector<64x1xf32> to vector<64x64xf32>
    %43 = arith.subf %39, %42 : vector<64x64xf32>
    %44 = math.exp %43 : vector<64x64xf32>
    %cst_14 = arith.constant dense<0.000000e+00> : vector<64xf32>
    %45 = vector.multi_reduction <add>, %44, %cst_14 [1] : vector<64x64xf32> to vector<64xf32>
    %46 = vector.shape_cast %45 : vector<64xf32> to vector<64x1xf32>
    %47 = tpu.reciprocal %46 {approx = true} : vector<64x1xf32> -> vector<64x1xf32>
    %48 = vector.broadcast %47 : vector<64x1xf32> to vector<64x64xf32>
    %49 = arith.mulf %44, %48 : vector<64x64xf32>
    %50 = arith.truncf %49 : vector<64x64xf32> to vector<64x64xbf16>
    %cst_15 = arith.constant dense<0.000000e+00> : vector<64x8xf32>
    %51 = tpu.matmul %50, %35, %cst_15 {dimension_numbers = #tpu.dot_dimension_numbers<[1], [0], [0], [1], [0, 0, 1, 1], [], []>} : vector<64x64xbf16>, vector<64x8xbf16>, vector<64x8xf32> -> vector<64x8xf32>
    %52 = vector.extract_strided_slice %7 {offsets = [0, 16], sizes = [64, 8], strides = [1, 1]} : vector<64x96xf32> to vector<64x8xf32>
    %53 = arith.truncf %52 : vector<64x8xf32> to vector<64x8xbf16>
    %54 = vector.extract_strided_slice %7 {offsets = [0, 48], sizes = [64, 8], strides = [1, 1]} : vector<64x96xf32> to vector<64x8xf32>
    %55 = arith.truncf %54 : vector<64x8xf32> to vector<64x8xbf16>
    %56 = vector.extract_strided_slice %7 {offsets = [0, 80], sizes = [64, 8], strides = [1, 1]} : vector<64x96xf32> to vector<64x8xf32>
    %57 = arith.truncf %56 : vector<64x8xf32> to vector<64x8xbf16>
    %58 = vector.extract_strided_slice %4 {offsets = [0, 16], sizes = [64, 8], strides = [1, 1]} : vector<64x32xbf16> to vector<64x8xbf16>
    %59 = tpu.concatenate %53, %58 in 1 : vector<64x8xbf16>, vector<64x8xbf16> -> vector<64x16xbf16>
    %60 = tpu.concatenate %55, %53 in 1 : vector<64x8xbf16>, vector<64x8xbf16> -> vector<64x16xbf16>
    %cst_16 = arith.constant dense<0.000000e+00> : vector<64x64xf32>
    %61 = tpu.matmul %59, %60, %cst_16 {dimension_numbers = #tpu.dot_dimension_numbers<[1], [1], [0], [0], [0, 0, 1, 0], [], []>} : vector<64x16xbf16>, vector<64x16xbf16>, vector<64x64xf32> -> vector<64x64xf32>
    %cst_17 = arith.constant dense<0xFF800000> : vector<64xf32>
    %62 = vector.multi_reduction <maximumf>, %61, %cst_17 [1] : vector<64x64xf32> to vector<64xf32>
    %63 = vector.shape_cast %62 : vector<64xf32> to vector<64x1xf32>
    %64 = vector.broadcast %63 : vector<64x1xf32> to vector<64x64xf32>
    %65 = arith.subf %61, %64 : vector<64x64xf32>
    %66 = math.exp %65 : vector<64x64xf32>
    %cst_18 = arith.constant dense<0.000000e+00> : vector<64xf32>
    %67 = vector.multi_reduction <add>, %66, %cst_18 [1] : vector<64x64xf32> to vector<64xf32>
    %68 = vector.shape_cast %67 : vector<64xf32> to vector<64x1xf32>
    %69 = tpu.reciprocal %68 {approx = true} : vector<64x1xf32> -> vector<64x1xf32>
    %70 = vector.broadcast %69 : vector<64x1xf32> to vector<64x64xf32>
    %71 = arith.mulf %66, %70 : vector<64x64xf32>
    %72 = arith.truncf %71 : vector<64x64xf32> to vector<64x64xbf16>
    %cst_19 = arith.constant dense<0.000000e+00> : vector<64x8xf32>
    %73 = tpu.matmul %72, %57, %cst_19 {dimension_numbers = #tpu.dot_dimension_numbers<[1], [0], [0], [1], [0, 0, 1, 1], [], []>} : vector<64x64xbf16>, vector<64x8xbf16>, vector<64x8xf32> -> vector<64x8xf32>
    %74 = vector.extract_strided_slice %7 {offsets = [0, 24], sizes = [64, 8], strides = [1, 1]} : vector<64x96xf32> to vector<64x8xf32>
    %75 = arith.truncf %74 : vector<64x8xf32> to vector<64x8xbf16>
    %76 = vector.extract_strided_slice %7 {offsets = [0, 56], sizes = [64, 8], strides = [1, 1]} : vector<64x96xf32> to vector<64x8xf32>
    %77 = arith.truncf %76 : vector<64x8xf32> to vector<64x8xbf16>
    %78 = vector.extract_strided_slice %7 {offsets = [0, 88], sizes = [64, 8], strides = [1, 1]} : vector<64x96xf32> to vector<64x8xf32>
    %79 = arith.truncf %78 : vector<64x8xf32> to vector<64x8xbf16>
    %80 = vector.extract_strided_slice %4 {offsets = [0, 24], sizes = [64, 8], strides = [1, 1]} : vector<64x32xbf16> to vector<64x8xbf16>
    %81 = tpu.concatenate %75, %80 in 1 : vector<64x8xbf16>, vector<64x8xbf16> -> vector<64x16xbf16>
    %82 = tpu.concatenate %77, %75 in 1 : vector<64x8xbf16>, vector<64x8xbf16> -> vector<64x16xbf16>
    %cst_20 = arith.constant dense<0.000000e+00> : vector<64x64xf32>
    %83 = tpu.matmul %81, %82, %cst_20 {dimension_numbers = #tpu.dot_dimension_numbers<[1], [1], [0], [0], [0, 0, 1, 0], [], []>} : vector<64x16xbf16>, vector<64x16xbf16>, vector<64x64xf32> -> vector<64x64xf32>
    %cst_21 = arith.constant dense<0xFF800000> : vector<64xf32>
    %84 = vector.multi_reduction <maximumf>, %83, %cst_21 [1] : vector<64x64xf32> to vector<64xf32>
    %85 = vector.shape_cast %84 : vector<64xf32> to vector<64x1xf32>
    %86 = vector.broadcast %85 : vector<64x1xf32> to vector<64x64xf32>
    %87 = arith.subf %83, %86 : vector<64x64xf32>
    %88 = math.exp %87 : vector<64x64xf32>
    %cst_22 = arith.constant dense<0.000000e+00> : vector<64xf32>
    %89 = vector.multi_reduction <add>, %88, %cst_22 [1] : vector<64x64xf32> to vector<64xf32>
    %90 = vector.shape_cast %89 : vector<64xf32> to vector<64x1xf32>
    %91 = tpu.reciprocal %90 {approx = true} : vector<64x1xf32> -> vector<64x1xf32>
    %92 = vector.broadcast %91 : vector<64x1xf32> to vector<64x64xf32>
    %93 = arith.mulf %88, %92 : vector<64x64xf32>
    %94 = arith.truncf %93 : vector<64x64xf32> to vector<64x64xbf16>
    %cst_23 = arith.constant dense<0.000000e+00> : vector<64x8xf32>
    %95 = tpu.matmul %94, %79, %cst_23 {dimension_numbers = #tpu.dot_dimension_numbers<[1], [0], [0], [1], [0, 0, 1, 1], [], []>} : vector<64x64xbf16>, vector<64x8xbf16>, vector<64x8xf32> -> vector<64x8xf32>
    %96 = tpu.concatenate %29, %51, %73, %95 in 1 : vector<64x8xf32>, vector<64x8xf32>, vector<64x8xf32>, vector<64x8xf32> -> vector<64x32xf32>
    %c0_24 = arith.constant 0 : index
    %c0_25 = arith.constant 0 : index
    %c0_26 = arith.constant 0 : index
    %97 = vector.load %arg5[%c0_24, %c0_25, %c0_26] : memref<1x64x32xf32, #tpu.memory_space<vmem>>, vector<1x64x32xf32>
    %98 = vector.shape_cast %97 : vector<1x64x32xf32> to vector<64x32xf32>
    %99 = vector.shape_cast %96 : vector<64x32xf32> to vector<1x64x32xf32>
    tpu.vector_store %arg5[%c0_24, %c0_25, %c0_26], %99 {strides = array<i32>} : memref<1x64x32xf32, #tpu.memory_space<vmem>>, vector<1x64x32xf32>,
    return
  }
  func.func @transform_0(%arg0: i32) -> (i32, i32, i32) {
    %c0_i32 = arith.constant 0 : i32
    %c0_i32_0 = arith.constant 0 : i32
    %c0_i32_1 = arith.constant 0 : i32
    return %arg0, %c0_i32, %c0_i32_0 : i32, i32, i32
  }
  func.func @transform_1(%arg0: i32) -> (i32, i32) {
    %c0_i32 = arith.constant 0 : i32
    %c0_i32_0 = arith.constant 0 : i32
    %c0_i32_1 = arith.constant 0 : i32
    return %c0_i32, %c0_i32_0 : i32, i32
  }
  func.func @transform_2(%arg0: i32) -> (i32, i32) {
    %c0_i32 = arith.constant 0 : i32
    %c0_i32_0 = arith.constant 0 : i32
    %c0_i32_1 = arith.constant 0 : i32
    return %c0_i32, %c0_i32_0 : i32, i32
  }
  func.func @transform_3(%arg0: i32) -> (i32, i32) {
    %c0_i32 = arith.constant 0 : i32
    %c0_i32_0 = arith.constant 0 : i32
    %c0_i32_1 = arith.constant 0 : i32
    return %c0_i32, %c0_i32_0 : i32, i32
  }
  func.func @transform_4(%arg0: i32) -> (i32, i32, i32) {
    %c0_i32 = arith.constant 0 : i32
    %c0_i32_0 = arith.constant 0 : i32
    %c0_i32_1 = arith.constant 0 : i32
    return %arg0, %c0_i32, %c0_i32_0 : i32, i32, i32
  }
}

</mosaic_0001>

<bundles_post_ra>
// kernel: mhsa_forward.1
= control target key start
LH: loop header
LB: loop body
LE: loop exit
PB: predicated region body
PF: predicated region fallthrough
CT: control target
= control target key end

     0   :  { %9 = vsyncpa [#allocation3], 0  ;;  %s3058_s0 = inlined_call_operand.vmem [shape: bf16[2,64,32], index: 0, kind: input, shape index: {}]   ;;  %s3059_s1 = inlined_call_operand.vmem [shape: bf16[32,96], index: 1, kind: input, shape index: {}]   ;;  %s3060_s2 = inlined_call_operand.vmem [shape: f32[1,96], index: 2, kind: input, shape index: {}]   ;;  %s3061_s3 = inlined_call_operand.vmem [shape: bf16[64,32], index: 3, kind: input, shape index: {}]   ;;  %s3062_s4 = inlined_call_operand.hbm [shape: f32[2,64,32], index: 4, kind: output, shape index: {}]  }
   0x1   :  { %11 = vsyncpa [#allocation3 + $0x1], 0  ;;  %s2378_s15 = smov 0   ;;  %s2380_s16 = smov 0  }
   0x2   :  { %s2382_s17 = smov 0   ;;  %s2384_s18 = smov 0  }
   0x3 LB: > { %s2399_s19 = sadd.s32 4294967295, %s2335_s18   ;;  %s1790_s20 = sadd.s32 4294967294, %s2335_s18   ;;  %s2335_s18 = sphi %s2384_s18, %s3068_s18   ;;  %s2331_s17 = sphi %s2382_s17, %s3067_s17   ;;  %s2327_s16 = sphi %s2380_s16, %s3066_s16   ;;  %s2323_s15 = sphi %s2378_s15, %s3065_s15  }
   0x4   : > { %s2403_s21 = sadd.s32 1, %s2335_s18   ;;  %s113_s22 = sadd.s32 1, %s2331_s17 }
   0x5   : > { %s110_s23 = ssub.s32 %s2335_s18, %s2403_s21  ;;  %p123_p0 = scmp.ne.s32.totalorder %s2331_s17, %s2327_s16 }
   0x6   : > { %p111_p1 = scmp.eq.s32.totalorder %s110_s23, 0  ;;  %p124_p2 = scmp.eq.s32.totalorder %s2399_s19, 1 }
   0x7   : > { %p129_p3 = scmp.ne.s32.totalorder %s2327_s16, %s2323_s15  ;;  %p130_p4 = scmp.eq.s32.totalorder %s1790_s20, 1 }
   0x8   : > { %s2414_s24 = scalar_select %p111_p1, %s2331_s17, %s113_s22  }
   0x9   : > { %p2416_p5 = por %p124_p2, %p123_p0  ;;  %p2420_p6 = por %p130_p4, %p129_p3 }
   0xa   : > { %p1793_p7 = scmp.ge.s32.totalorder %s2335_s18, 1  ;;  %p165_p8 = scmp.lt.s32.totalorder %s2335_s18, 3 }
   0xc   : > { %p166_p9 = pnand %p1793_p7, %p165_p8 }
   0xd   : > { %v2131_v0 = vld [vmem:[%s3059_s1] sm:$0xff] (!%p166_p9)   ;;  %p191_p10 = scmp.lt.s32.totalorder (!%p166_p9), %s2399_s19, 1  ;;  %v2132_v1 = vld [vmem:[%s3059_s1 + $0x8] sm:$0xff] (!%p166_p9)   ;;  %vm256_vm0 = vcmask (!%p166_p9), 261120   ;;  %s2337_s12 = smov (!%p166_p9), 96   ;;  %v2481_v29 = vld [vmem:[%s3061_s3 + $0x18] sm:$0xff] (!%p166_p9)  }
   0xe   : > { %169 = sbr.rel (%p166_p9) target bundleno = 3096 (0xc18), region = 36  ;;  %1921 = vmatprep.subr.bf16.mxu0 (!%p166_p9), %v2131_v0  ;;  %v1797_v7 = vld [vmem:[%s3060_s2] ss:$0 sm:$0xff] (!%p166_p9)  ;;  %s2338_s13 = smov (!%p166_p9), 8   ;;  %v2467_v27 = vld [vmem:[%s3061_s3 + $0x8] sm:$0xff] (!%p166_p9)   ;;  %v2486_v30 = vld [vmem:[%s3061_s3 + $0x10] sm:$0xff] (!%p166_p9)  }
   0xf   : > { %1922 = vmatpush3.bf16.msra.mxu0 (!%p166_p9), %v2131_v0  ;;  %v2472_v28 = vld [vmem:[%s3061_s3] sm:$0xff] (!%p166_p9)   ;;  %vm366_vm1 = vcmask (!%p166_p9), 64512   ;;  %vm411_vm2 = vcmask (!%p166_p9), 130048   ;;  %vm493_vm3 = vcmask (!%p166_p9), 523264   ;;  %s2341_s7 = smov (!%p166_p9), 120   ;;  %s2342_s8 = smov (!%p166_p9), 56  }
  0x10   : > { %1923 = vmatprep.subr.bf16.mxu0 (!%p166_p9), %v2132_v1  ;;  %s2344_s10 = smov (!%p166_p9), 112   ;;  %s2345_s11 = smov (!%p166_p9), 48   ;;  %vm1697_vm4 = vcmask (!%p166_p9), 195584  }
  0x11   : > { %s2347_s14 = smov (!%p166_p9), 104   ;;  %s2351_s28 = smov (!%p166_p9), [#allocation2]  }
  0x12   : > { %s2277_s29 = sshll.u32 (!%p166_p9), %s2351_s28, 4  ;;  %s2278_s29 = int_to_ptr.vmem [resolvable:$false] %s2277_s29 }
  0x13   : > { %1924 = vmatpush3.bf16.msra.mxu0 (!%p166_p9), %v2132_v1  ;;  %s2279_s30 = scalar_lea.vmem (!%p166_p9), %s2278_s29, 2048 }
  0x15   : > { %s192_s5 = scalar_select %p191_p10, %s2399_s19, 1 }
  0x17   : > { %s1849_s6 = sshll.u32 %s192_s5, 5  ;;  %s2339_s5 = smov 64  }
  0x18   : > { %s195_s9 = scalar_lea.vmem %s3058_s0, %s1849_s6  ;;  %s2340_s6 = smov 88  }
  0x19   : > { %v2133_v2 = vld [vmem:[%s195_s9] sm:$0xff]   ;;  %v2134_v3 = vld [vmem:[%s195_s9 + $0x8] sm:$0xff]   ;;  %v2135_v4 = vld [vmem:[%s195_s9 + $0x10] sm:$0xff]  }
  0x1a   : > { %1925 = vmatprep.mubr.msk.bf16.mxu0 %vm256_vm0, %v2133_v2  ;;  %v2136_v5 = vld [vmem:[%s195_s9 + $0x18] sm:$0xff]   ;;  %s2343_s9 = smov 80  }
  0x1b   : > { %1926 = vmatmul.mubr.msk.bf16.vlgmr.msra.gmra.mrb[0].mxu0 %vm256_vm0, %v2134_v3 }
  0x1c   : > { %1929 = vmatprep.mubr.msk.bf16.mxu0 %vm256_vm0, %v2135_v4 }
  0x23   : > { %1930 = vmatmul.mubr.msk.bf16.gmra.mrb[4].mxu0 %vm256_vm0, %v2136_v5 }
  0xee   : > { %v1927_v6 = vpop.f32.mrb[0].mxu0 }
  0xef   : > { %v303_v8 = vpop.f32.mrb[1].mxu0  ;;  %v312_v10 = vadd.f32 %v1927_v6, %v1797_v7 }
  0xf0   : > { %v1928_v9 = vpop.f32.mrb[2].mxu0  ;;  %v304_v13 = vadd.f32 %v1797_v7, %v303_v8 }
  0xf1   : > { %v315_v11 = vadd.f32 %v1928_v9, %v1797_v7  ;;  %v306_v12 = vpop.f32.mrb[3].mxu0 }
  0xf2   : > { %v307_v14 = vadd.f32 %v1797_v7, %v306_v12 }
  0xf3   : > { %v2444_v15 = vpack.c.bf16 %v315_v11, %v312_v10 }
  0xf4   : > { %v2446_v16 = vpack.c.bf16 %v307_v14, %v304_v13 }
  0xf5   : > { %385 = vrot.lane.b32.xlu1 %v2444_v15, %s2337_s12 }
  0xf6   : > { %v1931_v17 = vpop.f32.mrb[4].mxu0  ;;  %383 = vrot.lane.b32.xlu0 %v2446_v16, %s2337_s12 }
  0xf7   : > { %v328_v18 = vadd.f32 %v1931_v17, %v1797_v7  ;;  %v319_v19 = vpop.f32.mrb[5].mxu0 }
  0xf8   : > { %v320_v20 = vadd.f32 %v1797_v7, %v319_v19  ;;  %v1932_v21 = vpop.f32.mrb[6].mxu0 }
  0xf9   : > { %v331_v22 = vadd.f32 %v1932_v21, %v1797_v7  ;;  %393 = vrot.lane.b32.xlu1 %v2444_v15, %s2338_s13  ;;  %v322_v23 = vpop.f32.mrb[7].mxu0 }
  0xfa   : > { %v323_v24 = vadd.f32 %v1797_v7, %v322_v23  ;;  %391 = vrot.lane.b32.xlu0 %v2446_v16, %s2338_s13 }
  0xfb   : > { %v2454_v25 = vpack.c.bf16 %v331_v22, %v328_v18 }
  0xfc   : > { %v2456_v26 = vpack.c.bf16 %v323_v24, %v320_v20 }
  0xfe   : > { %395 = vrot.lane.b32.xlu1 %v2456_v26, %s2338_s13  ;;  %387 = vrot.lane.b32.xlu0 %v2456_v26, %s2337_s12 }
 0x102   : > { %397 = vrot.lane.b32.xlu1 %v2454_v25, %s2338_s13  ;;  %389 = vrot.lane.b32.xlu0 %v2454_v25, %s2337_s12  ;;  %s2346_s12 = smov 72  }
 0x106   : > { %360 = vrot.lane.b32.xlu1 %v2467_v27, %s2338_s13  ;;  %358 = vrot.lane.b32.xlu0 %v2472_v28, %s2338_s13 }
 0x10a   : > { %364 = vrot.lane.b32.xlu1 %v2481_v29, %s2338_s13  ;;  %362 = vrot.lane.b32.xlu0 %v2486_v30, %s2338_s13 }
 0x167   : > { %v386_v31 = vpop.permute.xlu1 %385 }
 0x168   : > { %v384_v32 = vpop.permute.xlu0 %383 }
 0x16b   : > { %v394_v33 = vpop.permute.xlu1 %393 }
 0x16c   : > { %v392_v34 = vpop.permute.xlu0 %391  ;;  %v404_v37 = vsel %vm366_vm1, %v386_v31, %v394_v33 }
 0x16d   : > { %v401_v35 = vsel %vm366_vm1, %v384_v32, %v392_v34  ;;  %v422_v42 = vsel %vm411_vm2, %v404_v37, 0 }
 0x16e   : > { %2061 = vmatprep.subr.msk.bf16.mxu1 %vm411_vm2, %v401_v35  ;;  %v420_v36 = vsel %vm411_vm2, %v401_v35, 0 }
 0x16f   : > { %1934 = vmatpush3.bf16.xpose.msra.mxu1 %v420_v36 }
 0x170   : > { %2062 = vmatprep.subr.msk.bf16.mxu1 %vm411_vm2, %v404_v37  ;;  %v388_v38 = vpop.permute.xlu0 %387  ;;  %v396_v39 = vpop.permute.xlu1 %395 }
 0x171   : > { %v407_v41 = vsel %vm366_vm1, %v388_v38, %v396_v39 }
 0x172   : > { %v424_v46 = vsel %vm411_vm2, %v407_v41, 0 }
 0x174   : > { %v390_v40 = vpop.permute.xlu0 %389  ;;  %v398_v45 = vpop.permute.xlu1 %397 }
 0x175   : > { %v410_v47 = vsel %vm366_vm1, %v390_v40, %v398_v45 }
 0x176   : > { %v426_v48 = vsel %vm411_vm2, %v410_v47, 0 }
 0x177   : > { %1936 = vmatpush3.bf16.xpose.msra.mxu1 %v422_v42 }
 0x178   : > { %v359_v43 = vpop.permute.xlu0 %358  ;;  %2063 = vmatprep.subr.msk.bf16.mxu1 %vm411_vm2, %v407_v41  ;;  %v361_v49 = vpop.permute.xlu1 %360 }
 0x179   : > { %v369_v44 = vsel %vm366_vm1, %v2446_v16, %v359_v43  ;;  %v372_v51 = vsel %vm366_vm1, %v2444_v15, %v361_v49 }
 0x17a   : > { %1941 = vmatprep.mubr.msk.bf16.mxu1 %vm411_vm2, %v369_v44 }
 0x17c   : > { %v363_v50 = vpop.permute.xlu0 %362  ;;  %v365_v53 = vpop.permute.xlu1 %364 }
 0x17d   : > { %v375_v52 = vsel %vm366_vm1, %v2456_v26, %v363_v50  ;;  %v378_v54 = vsel %vm366_vm1, %v2454_v25, %v365_v53 }
 0x17f   : > { %1938 = vmatpush3.bf16.xpose.msra.mxu1 %v424_v46 }
 0x180   : > { %2064 = vmatprep.subr.msk.bf16.mxu1 %vm411_vm2, %v410_v47 }
 0x187   : > { %1940 = vmatpush3.bf16.xpose.msra.mxu1 %v426_v48 }
 0x18e   : > { %1942 = vmatmul.mubr.msk.bf16.vlgmr.msra.gmra.mrb[0].mxu1 %vm411_vm2, %v372_v51 }
 0x18f   : > { %1945 = vmatprep.mubr.msk.bf16.mxu1 %vm411_vm2, %v375_v52 }
 0x196   : > { %1946 = vmatmul.mubr.msk.bf16.gmra.mrb[4].mxu1 %vm411_vm2, %v378_v54 }
 0x261   : > { %v1943_v55 = vpop.f32.mrb[0].mxu1 }
 0x262   : > { %v462_v56 = vpop.f32.mrb[1].mxu1  ;;  %v500_v57 = vsel %vm493_vm3, %v1943_v55, -inf }
 0x263   : > { %501 = vmax.xlane.f32.xlu0 %v500_v57  ;;  %v1944_v58 = vpop.f32.mrb[2].mxu1  ;;  %v494_v61 = vsel %vm493_vm3, %v462_v56, -inf }
 0x264   : > { %v465_v59 = vpop.f32.mrb[3].mxu1  ;;  %v503_v0 = vsel %vm493_vm3, %v1944_v58, -inf }
 0x265   : > { %v497_v60 = vsel %vm493_vm3, %v465_v59, -inf }
 0x266   : > { %498 = vmax.xlane.f32.xlu1 %v497_v60 }
 0x267   : > { %495 = vmax.xlane.f32.xlu0 %v494_v61 }
 0x269   : > { %v1947_v62 = vpop.f32.mrb[4].mxu1 }
 0x26a   : > { %v478_v63 = vpop.f32.mrb[5].mxu1  ;;  %v512_v1 = vsel %vm493_vm3, %v1947_v62, -inf }
 0x26b   : > { %504 = vmax.xlane.f32.xlu0 %v503_v0  ;;  %513 = vmax.xlane.f32.xlu1 %v512_v1  ;;  %v1948_v2 = vpop.f32.mrb[6].mxu1  ;;  %v506_v5 = vsel %vm493_vm3, %v478_v63, -inf }
 0x26c   : > { %v2521_v3 = vpop.f32.mrb[7].mxu1  ;;  %v515_v6 = vsel %vm493_vm3, %v1948_v2, -inf }
 0x26d   : > { %v509_v4 = vsel %vm493_vm3, %v2521_v3, -inf }
 0x26f   : > { %507 = vmax.xlane.f32.xlu1 %v506_v5  ;;  %510 = vmax.xlane.f32.xlu0 %v509_v4 }
 0x273   : > { %516 = vmax.xlane.f32.xlu0 %v515_v6 }
 0x280   : > { %586 = vrot.lane.b32.xlu1 %v2446_v16, %s2339_s5 }
 0x284   : > { %590 = vrot.lane.b32.xlu1 %v2456_v26, %s2339_s5 }
 0x288   : > { %592 = vrot.lane.b32.xlu1 %v2454_v25, %s2339_s5 }
 0x289   : > { %588 = vrot.lane.b32.xlu0 %v2444_v15, %s2339_s5 }
 0x28c   : > { %695 = vrot.lane.b32.xlu1 %v2446_v16, %s2340_s6 }
 0x2f0   : > { %v502_v7 = vpop.xlane.xlu0 %501 }
 0x2f1   : > { %v520_v8 = vsub.f32 %v1943_v55, %v502_v7 }
 0x2f3   : > { %v530_v9 = vmul.f32 1.442695, %v520_v8  ;;  %v499_v10 = vpop.xlane.xlu1 %498 }
 0x2f4   : > { %v496_v11 = vpop.xlane.xlu0 %495  ;;  %v519_v14 = vsub.f32 %v465_v59, %v499_v10 }
 0x2f5   : > { %2141 = vpow2.f32 %v530_v9  ;;  %v518_v12 = vsub.f32 %v462_v56, %v496_v11 }
 0x2f6   : > { %v528_v21 = vmul.f32 1.442695, %v519_v14 }
 0x2f7   : > { %v526_v13 = vmul.f32 1.442695, %v518_v12 }
 0x2f8   : > { %v514_v17 = vpop.xlane.xlu1 %513  ;;  %v505_v18 = vpop.xlane.xlu0 %504 }
 0x2f9   : > { %2143 = vpow2.f32 %v526_v13  ;;  %v521_v19 = vsub.f32 %v1944_v58, %v505_v18  ;;  %v524_v22 = vsub.f32 %v1947_v62, %v514_v17 }
 0x2fb   : > { %v532_v20 = vmul.f32 1.442695, %v521_v19  ;;  %v538_v32 = vmul.f32 1.442695, %v524_v22 }
 0x2fc   : > { %v508_v23 = vpop.xlane.xlu1 %507  ;;  %v511_v24 = vpop.xlane.xlu0 %510 }
 0x2fd   : > { %2145 = vpow2.f32 %v532_v20  ;;  %v522_v33 = vsub.f32 %v478_v63, %v508_v23  ;;  %v523_v57 = vsub.f32 %v2521_v3, %v511_v24 }
 0x2fe   : > { %2147 = vpow2.f32 %v528_v21 }
 0x2ff   : > { %v2533_v31 = vpop.eup %2141  ;;  %2149 = vpow2.f32 %v538_v32  ;;  %v534_v38 = vmul.f32 1.442695, %v522_v33  ;;  %v536_v58 = vmul.f32 1.442695, %v523_v57 }
 0x300   : > { %v587_v34 = vpop.permute.xlu1 %586  ;;  %v517_v35 = vpop.xlane.xlu0 %516  ;;  %v548_v36 = vsel %vm493_vm3, %v2533_v31, 0.0 }
 0x301   : > { %1949 = vmatprep.subr.bf16.mxu0 %v587_v34  ;;  %549 = vadd.xlane.f32.xlu1 %v548_v36  ;;  %v525_v39 = vsub.f32 %v1948_v2, %v517_v35  ;;  %2151 = vpow2.f32 %v534_v38 }
 0x302   : > { %1950 = vmatpush3.bf16.msra.mxu0 %v587_v34 }
 0x303   : > { %v2537_v37 = vpop.eup %2143  ;;  %v540_v44 = vmul.f32 1.442695, %v525_v39 }
 0x304   : > { %v591_v40 = vpop.permute.xlu1 %590  ;;  %v589_v41 = vpop.permute.xlu0 %588  ;;  %v542_v42 = vsel %vm493_vm3, %v2537_v37, 0.0 }
 0x305   : > { %543 = vadd.xlane.f32.xlu1 %v542_v42  ;;  %1951 = vmatprep.subr.bf16.mxu0 %v589_v41  ;;  %2153 = vpow2.f32 %v540_v44 }
 0x306   : > { %1952 = vmatpush3.bf16.msra.mxu0 %v589_v41  ;;  %2155 = vpow2.f32 %v536_v58 }
 0x307   : > { %1953 = vmatprep.subr.bf16.mxu0 %v591_v40  ;;  %v2146_v43 = vpop.eup %2145 }
 0x308   : > { %v593_v45 = vpop.permute.xlu1 %592  ;;  %v551_v46 = vsel %vm493_vm3, %v2146_v43, 0.0  ;;  %v2148_v47 = vpop.eup %2147 }
 0x309   : > { %552 = vadd.xlane.f32.xlu0 %v551_v46  ;;  %v545_v50 = vsel %vm493_vm3, %v2148_v47, 0.0  ;;  %v2545_v51 = vpop.eup %2149 }
 0x30a   : > { %1954 = vmatpush3.bf16.msra.mxu0 %v591_v40  ;;  %v560_v52 = vsel %vm493_vm3, %v2545_v51, 0.0 }
 0x30b   : > { %1955 = vmatprep.subr.bf16.mxu0 %v593_v45  ;;  %v2550_v53 = vpop.eup %2151 }
 0x30c   : > { %v696_v48 = vpop.permute.xlu1 %695  ;;  %v554_v54 = vsel %vm493_vm3, %v2550_v53, 0.0 }
 0x30d   : > { %v704_v49 = vsel %vm366_vm1, %v696_v48, %v2446_v16  ;;  %546 = vadd.xlane.f32.xlu0 %v545_v50 }
 0x30e   : > { %1956 = vmatpush3.bf16.msra.mxu0 %v593_v45  ;;  %v719_v17 = vsel %vm411_vm2, %v704_v49, 0 }
 0x30f   : > { %2065 = vmatprep.subr.msk.bf16.mxu0 %vm411_vm2, %v704_v49  ;;  %v2554_v55 = vpop.eup %2153 }
 0x310   : > { %v563_v56 = vsel %vm493_vm3, %v2554_v55, 0.0  ;;  %v2156_v59 = vpop.eup %2155 }
 0x311   : > { %561 = vadd.xlane.f32.xlu0 %v560_v52  ;;  %v557_v60 = vsel %vm493_vm3, %v2156_v59, 0.0 }
 0x315   : > { %555 = vadd.xlane.f32.xlu0 %v554_v54 }
 0x316   : > { %699 = vrot.lane.b32.xlu1 %v2456_v26, %s2340_s6 }
 0x319   : > { %564 = vadd.xlane.f32.xlu0 %v563_v56 }
 0x32f   : > { %697 = vrot.lane.b32.xlu0 %v2444_v15, %s2340_s6 }
 0x333   : > { %675 = vrot.lane.b32.xlu0 %v2446_v16, %s2341_s7 }
 0x337   : > { %679 = vrot.lane.b32.xlu0 %v2456_v26, %s2341_s7 }
 0x33a   : > { %558 = vadd.xlane.f32.xlu1 %v557_v60 }
 0x34b   : > { %701 = vrot.lane.b32.xlu1 %v2454_v25, %s2340_s6  ;;  %s2348_s6 = smov 40  }
 0x34f   : > { %677 = vrot.lane.b32.xlu1 %v2444_v15, %s2341_s7 }
 0x353   : > { %681 = vrot.lane.b32.xlu1 %v2454_v25, %s2341_s7 }
 0x38e   : > { %v550_v61 = vpop.xlane.xlu1 %549 }
 0x392   : > { %v544_v62 = vpop.xlane.xlu1 %543 }
 0x396   : > { %v553_v63 = vpop.xlane.xlu0 %552  ;;  %v700_v19 = vpop.permute.xlu1 %699 }
 0x397   : > { %2157 = vrcp.f32 %v553_v63  ;;  %v708_v21 = vsel %vm366_vm1, %v700_v19, %v2456_v26 }
 0x398   : > { %2159 = vrcp.f32 %v544_v62  ;;  %v723_v22 = vsel %vm411_vm2, %v708_v21, 0 }
 0x399   : > { %2161 = vrcp.f32 %v550_v61 }
 0x39a   : > { %v547_v0 = vpop.xlane.xlu0 %546 }
 0x39b   : > { %2163 = vrcp.f32 %v547_v0 }
 0x39e   : > { %v562_v1 = vpop.xlane.xlu0 %561 }
 0x3a1   : > { %v2158_v2 = vpop.eup %2157 }
 0x3a2   : > { %v556_v3 = vpop.xlane.xlu0 %555  ;;  %v2160_v4 = vpop.eup %2159  ;;  %v577_v7 = vmul.f32 %v2158_v2, %v2146_v43 }
 0x3a3   : > { %v2162_v5 = vpop.eup %2161  ;;  %v574_v9 = vmul.f32 %v2160_v4, %v2537_v37 }
 0x3a4   : > { %v576_v11 = vmul.f32 %v2162_v5, %v2533_v31 }
 0x3a5   : > { %v2164_v6 = vpop.eup %2163 }
 0x3a6   : > { %v565_v8 = vpop.xlane.xlu0 %564  ;;  %v575_v10 = vmul.f32 %v2164_v6, %v2148_v47  ;;  %v583_v13 = vpack.c.bf16 %v577_v7, %v576_v11 }
 0x3a7   : > { %2165 = vrcp.f32 %v565_v8 }
 0x3a8   : > { %v582_v12 = vpack.c.bf16 %v575_v10, %v574_v9  ;;  %2167 = vrcp.f32 %v556_v3 }
 0x3a9   : > { %2169 = vrcp.f32 %v562_v1 }
 0x3aa   : > { %1957 = vmatprep.mubr.msk.bf16.mxu0 %vm493_vm3, %v582_v12  ;;  %v698_v14 = vpop.permute.xlu0 %697 }
 0x3ab   : > { %v706_v18 = vsel %vm366_vm1, %v698_v14, %v2444_v15  ;;  %1958 = vmatmul.mubr.msk.bf16.vlgmr.msra.gmra.mrb[8].mxu0 %vm493_vm3, %v583_v13 }
 0x3ac   : > { %1966 = vmatpush3.bf16.xpose.msra.mxu0 %v719_v17  ;;  %v721_v20 = vsel %vm411_vm2, %v706_v18, 0 }
 0x3ad   : > { %2066 = vmatprep.subr.msk.bf16.mxu0 %vm411_vm2, %v706_v18 }
 0x3ae   : > { %v2594_v41 = vpop.permute.xlu0 %675 }
 0x3af   : > { %v685_v44 = vsel %vm366_vm1, %v2594_v41, %v2472_v28 }
 0x3b1   : > { %v2166_v33 = vpop.eup %2165 }
 0x3b2   : > { %v2168_v34 = vpop.eup %2167  ;;  %v581_v37 = vmul.f32 %v2166_v33, %v2554_v55  ;;  %v2604_v46 = vpop.permute.xlu0 %679 }
 0x3b3   : > { %v2170_v35 = vpop.eup %2169  ;;  %v578_v38 = vmul.f32 %v2168_v34, %v2550_v53  ;;  %v691_v48 = vsel %vm366_vm1, %v2604_v46, %v2486_v30 }
 0x3b4   : > { %1968 = vmatpush3.bf16.xpose.msra.mxu0 %v721_v20  ;;  %v580_v40 = vmul.f32 %v2170_v35, %v2545_v51 }
 0x3b5   : > { %2067 = vmatprep.subr.msk.bf16.mxu0 %vm411_vm2, %v708_v21 }
 0x3b6   : > { %v585_v43 = vpack.c.bf16 %v581_v37, %v580_v40 }
 0x3bc   : > { %1970 = vmatpush3.bf16.xpose.msra.mxu0 %v723_v22 }
 0x3c7   : > { %v559_v23 = vpop.xlane.xlu1 %558 }
 0x3c8   : > { %2171 = vrcp.f32 %v559_v23 }
 0x3cb   : > { %v702_v24 = vpop.permute.xlu1 %701 }
 0x3cc   : > { %v710_v31 = vsel %vm366_vm1, %v702_v24, %v2454_v25 }
 0x3cd   : > { %v725_v32 = vsel %vm411_vm2, %v710_v31, 0  ;;  %2068 = vmatprep.subr.msk.bf16.mxu0 %vm411_vm2, %v710_v31 }
 0x3ce   : > { %1972 = vmatpush3.bf16.xpose.msra.mxu0 %v725_v32 }
 0x3cf   : > { %v2602_v45 = vpop.permute.xlu1 %677 }
 0x3d0   : > { %v688_v47 = vsel %vm366_vm1, %v2602_v45, %v2467_v27 }
 0x3d2   : > { %v2172_v36 = vpop.eup %2171 }
 0x3d3   : > { %v579_v39 = vmul.f32 %v2172_v36, %v2156_v59  ;;  %v2614_v49 = vpop.permute.xlu1 %681 }
 0x3d4   : > { %v694_v50 = vsel %vm366_vm1, %v2614_v49, %v2481_v29 }
 0x3d5   : > { %v584_v42 = vpack.c.bf16 %v579_v39, %v578_v38 }
 0x3d7   : > { %1961 = vmatprep.mubr.msk.bf16.mxu0 %vm493_vm3, %v584_v42 }
 0x3d8   : > { %1962 = vmatmul.mubr.msk.bf16.gmra.mrb[12].mxu0 %vm493_vm3, %v585_v43 }
 0x3d9   : > { %1973 = vmatprep.mubr.msk.bf16.mxu0 %vm411_vm2, %v685_v44 }
 0x3e0   : > { %1974 = vmatmul.mubr.msk.bf16.vlgmr.msra.gmra.mrb[16].mxu0 %vm411_vm2, %v688_v47 }
 0x3e1   : > { %1977 = vmatprep.mubr.msk.bf16.mxu0 %vm411_vm2, %v691_v48 }
 0x3e8   : > { %1978 = vmatmul.mubr.msk.bf16.gmra.mrb[20].mxu0 %vm411_vm2, %v694_v50 }
 0x47e   : > { %v2620_v51 = vpop.f32.mrb[8].mxu0 }
 0x47f   : > { %v2622_v52 = vpop.f32.mrb[9].mxu0 }
 0x480   : > { %v2624_v53 = vpop.f32.mrb[10].mxu0 }
 0x481   : > { %v2626_v54 = vpop.f32.mrb[11].mxu0 }
 0x4ab   : > { %v2628_v55 = vpop.f32.mrb[12].mxu0 }
 0x4ac   : > { %v2630_v56 = vpop.f32.mrb[13].mxu0 }
 0x4ad   : > { %v2632_v57 = vpop.f32.mrb[14].mxu0 }
 0x4ae   : > { %v2634_v58 = vpop.f32.mrb[15].mxu0 }
 0x4b3   : > { %v1975_v59 = vpop.f32.mrb[16].mxu0 }
 0x4b4   : > { %v761_v60 = vpop.f32.mrb[17].mxu0  ;;  %v798_v61 = vsel %vm493_vm3, %v1975_v59, -inf }
 0x4b5   : > { %799 = vmax.xlane.f32.xlu0 %v798_v61  ;;  %v1976_v62 = vpop.f32.mrb[18].mxu0  ;;  %v792_v1 = vsel %vm493_vm3, %v761_v60, -inf }
 0x4b6   : > { %v764_v63 = vpop.f32.mrb[19].mxu0  ;;  %v801_v4 = vsel %vm493_vm3, %v1976_v62, -inf }
 0x4b7   : > { %v795_v0 = vsel %vm493_vm3, %v764_v63, -inf }
 0x4b8   : > { %796 = vmax.xlane.f32.xlu1 %v795_v0 }
 0x4b9   : > { %793 = vmax.xlane.f32.xlu0 %v792_v1 }
 0x4bb   : > { %v1979_v2 = vpop.f32.mrb[20].mxu0 }
 0x4bc   : > { %v777_v3 = vpop.f32.mrb[21].mxu0  ;;  %v810_v5 = vsel %vm493_vm3, %v1979_v2, -inf }
 0x4bd   : > { %802 = vmax.xlane.f32.xlu0 %v801_v4  ;;  %811 = vmax.xlane.f32.xlu1 %v810_v5  ;;  %v1980_v6 = vpop.f32.mrb[22].mxu0  ;;  %v804_v9 = vsel %vm493_vm3, %v777_v3, -inf }
 0x4be   : > { %v2641_v7 = vpop.f32.mrb[23].mxu0  ;;  %v813_v10 = vsel %vm493_vm3, %v1980_v6, -inf }
 0x4bf   : > { %v807_v8 = vsel %vm493_vm3, %v2641_v7, -inf }
 0x4c1   : > { %805 = vmax.xlane.f32.xlu1 %v804_v9  ;;  %808 = vmax.xlane.f32.xlu0 %v807_v8 }
 0x4c5   : > { %814 = vmax.xlane.f32.xlu0 %v813_v10 }
 0x4d2   : > { %884 = vrot.lane.b32.xlu1 %v2446_v16, %s2342_s8 }
 0x4d6   : > { %888 = vrot.lane.b32.xlu1 %v2456_v26, %s2342_s8 }
 0x4da   : > { %890 = vrot.lane.b32.xlu1 %v2454_v25, %s2342_s8 }
 0x4db   : > { %886 = vrot.lane.b32.xlu0 %v2444_v15, %s2342_s8  ;;  %s2350_s8 = smov 24  }
 0x4de   : > { %1001 = vrot.lane.b32.xlu1 %v2446_v16, %s2343_s9 }
 0x542   : > { %v800_v11 = vpop.xlane.xlu0 %799 }
 0x543   : > { %v818_v12 = vsub.f32 %v1975_v59, %v800_v11 }
 0x545   : > { %v828_v13 = vmul.f32 1.442695, %v818_v12  ;;  %v797_v14 = vpop.xlane.xlu1 %796 }
 0x546   : > { %v794_v17 = vpop.xlane.xlu0 %793  ;;  %v817_v20 = vsub.f32 %v764_v63, %v797_v14 }
 0x547   : > { %2173 = vpow2.f32 %v828_v13  ;;  %v816_v18 = vsub.f32 %v761_v60, %v794_v17 }
 0x548   : > { %v826_v31 = vmul.f32 1.442695, %v817_v20 }
 0x549   : > { %v824_v19 = vmul.f32 1.442695, %v816_v18 }
 0x54a   : > { %v812_v21 = vpop.xlane.xlu1 %811  ;;  %v803_v22 = vpop.xlane.xlu0 %802 }
 0x54b   : > { %2175 = vpow2.f32 %v824_v19  ;;  %v819_v23 = vsub.f32 %v1976_v62, %v803_v22  ;;  %v822_v32 = vsub.f32 %v1979_v2, %v812_v21 }
 0x54d   : > { %v830_v24 = vmul.f32 1.442695, %v819_v23  ;;  %v836_v36 = vmul.f32 1.442695, %v822_v32 }
 0x54e   : > { %v806_v33 = vpop.xlane.xlu1 %805  ;;  %v809_v34 = vpop.xlane.xlu0 %808 }
 0x54f   : > { %2177 = vpow2.f32 %v830_v24  ;;  %v820_v37 = vsub.f32 %v777_v3, %v806_v33  ;;  %v821_v9 = vsub.f32 %v2641_v7, %v809_v34 }
 0x550   : > { %2179 = vpow2.f32 %v826_v31 }
 0x551   : > { %v2653_v35 = vpop.eup %2173  ;;  %2181 = vpow2.f32 %v836_v36  ;;  %v832_v43 = vmul.f32 1.442695, %v820_v37  ;;  %v834_v10 = vmul.f32 1.442695, %v821_v9 }
 0x552   : > { %v885_v38 = vpop.permute.xlu1 %884  ;;  %v815_v39 = vpop.xlane.xlu0 %814  ;;  %v846_v40 = vsel %vm493_vm3, %v2653_v35, 0.0 }
 0x553   : > { %1981 = vmatprep.subr.bf16.mxu1 %v885_v38  ;;  %847 = vadd.xlane.f32.xlu1 %v846_v40  ;;  %v823_v44 = vsub.f32 %v1980_v6, %v815_v39  ;;  %2183 = vpow2.f32 %v832_v43 }
 0x554   : > { %1982 = vmatpush3.bf16.msra.mxu1 %v885_v38 }
 0x555   : > { %v2657_v42 = vpop.eup %2175  ;;  %v838_v60 = vmul.f32 1.442695, %v823_v44 }
 0x556   : > { %v889_v47 = vpop.permute.xlu1 %888  ;;  %v887_v48 = vpop.permute.xlu0 %886  ;;  %v840_v50 = vsel %vm493_vm3, %v2657_v42, 0.0 }
 0x557   : > { %841 = vadd.xlane.f32.xlu1 %v840_v50  ;;  %1983 = vmatprep.subr.bf16.mxu1 %v887_v48  ;;  %2185 = vpow2.f32 %v838_v60 }
 0x558   : > { %1984 = vmatpush3.bf16.msra.mxu1 %v887_v48  ;;  %2187 = vpow2.f32 %v834_v10 }
 0x559   : > { %1985 = vmatprep.subr.bf16.mxu1 %v889_v47  ;;  %v2178_v59 = vpop.eup %2177 }
 0x55a   : > { %v891_v61 = vpop.permute.xlu1 %890  ;;  %v849_v62 = vsel %vm493_vm3, %v2178_v59, 0.0  ;;  %v2180_v63 = vpop.eup %2179 }
 0x55b   : > { %850 = vadd.xlane.f32.xlu0 %v849_v62  ;;  %v843_v2 = vsel %vm493_vm3, %v2180_v63, 0.0  ;;  %v2665_v3 = vpop.eup %2181 }
 0x55c   : > { %1986 = vmatpush3.bf16.msra.mxu1 %v889_v47  ;;  %v858_v4 = vsel %vm493_vm3, %v2665_v3, 0.0 }
 0x55d   : > { %1987 = vmatprep.subr.bf16.mxu1 %v891_v61  ;;  %v2670_v5 = vpop.eup %2183 }
 0x55e   : > { %v1002_v0 = vpop.permute.xlu1 %1001  ;;  %v852_v6 = vsel %vm493_vm3, %v2670_v5, 0.0 }
 0x55f   : > { %v1010_v1 = vsel %vm366_vm1, %v1002_v0, %v2594_v41  ;;  %844 = vadd.xlane.f32.xlu0 %v843_v2 }
 0x560   : > { %1988 = vmatpush3.bf16.msra.mxu1 %v891_v61  ;;  %v1025_v34 = vsel %vm411_vm2, %v1010_v1, 0 }
 0x561   : > { %2069 = vmatprep.subr.msk.bf16.mxu1 %vm411_vm2, %v1010_v1  ;;  %v2674_v8 = vpop.eup %2185 }
 0x562   : > { %v861_v41 = vsel %vm493_vm3, %v2674_v8, 0.0  ;;  %v2188_v11 = vpop.eup %2187 }
 0x563   : > { %859 = vadd.xlane.f32.xlu0 %v858_v4  ;;  %v855_v12 = vsel %vm493_vm3, %v2188_v11, 0.0 }
 0x567   : > { %853 = vadd.xlane.f32.xlu0 %v852_v6 }
 0x568   : > { %1005 = vrot.lane.b32.xlu1 %v2456_v26, %s2343_s9 }
 0x56b   : > { %862 = vadd.xlane.f32.xlu0 %v861_v41 }
 0x56c   : > { %1007 = vrot.lane.b32.xlu1 %v2454_v25, %s2343_s9 }
 0x581   : > { %1003 = vrot.lane.b32.xlu0 %v2444_v15, %s2343_s9  ;;  %s188_s9 = sand.u32 1, %s2327_s16  }
 0x582   : > { %s3016_s23 = scalar_lea.sflag [#allocation3], %s188_s9 }
 0x585   : > { %973 = vrot.lane.b32.xlu0 %v2446_v16, %s2344_s10 }
 0x589   : > { %975 = vrot.lane.b32.xlu0 %v2444_v15, %s2344_s10 }
 0x58d   : > { %977 = vrot.lane.b32.xlu0 %v2456_v26, %s2344_s10 }
 0x590   : > { %856 = vadd.xlane.f32.xlu1 %v855_v12 }
 0x591   : > { %979 = vrot.lane.b32.xlu0 %v2454_v25, %s2344_s10 }
 0x5a1   : > { %981 = vrot.lane.b32.xlu1 %v2472_v28, %s2341_s7 }
 0x5a5   : > { %983 = vrot.lane.b32.xlu1 %v2467_v27, %s2341_s7 }
 0x5a9   : > { %985 = vrot.lane.b32.xlu1 %v2486_v30, %s2341_s7 }
 0x5ad   : > { %987 = vrot.lane.b32.xlu1 %v2481_v29, %s2341_s7  ;;  %s2349_s7 = smov 16  }
 0x5e0   : > { %v848_v7 = vpop.xlane.xlu1 %847 }
 0x5e4   : > { %v842_v13 = vpop.xlane.xlu1 %841 }
 0x5e8   : > { %v851_v14 = vpop.xlane.xlu0 %850  ;;  %v1006_v37 = vpop.permute.xlu1 %1005 }
 0x5e9   : > { %2189 = vrcp.f32 %v851_v14 }
 0x5ea   : > { %2191 = vrcp.f32 %v842_v13 }
 0x5eb   : > { %2193 = vrcp.f32 %v848_v7 }
 0x5ec   : > { %v845_v17 = vpop.xlane.xlu0 %844  ;;  %v1008_v39 = vpop.permute.xlu1 %1007 }
 0x5ed   : > { %2195 = vrcp.f32 %v845_v17 }
 0x5f0   : > { %v860_v18 = vpop.xlane.xlu0 %859 }
 0x5f3   : > { %v2190_v19 = vpop.eup %2189 }
 0x5f4   : > { %v854_v28 = vpop.xlane.xlu0 %853  ;;  %v2192_v20 = vpop.eup %2191  ;;  %v875_v22 = vmul.f32 %v2190_v19, %v2178_v59 }
 0x5f5   : > { %v2194_v21 = vpop.eup %2193  ;;  %v872_v30 = vmul.f32 %v2192_v20, %v2657_v42 }
 0x5f6   : > { %v874_v29 = vmul.f32 %v2194_v21, %v2653_v35  ;;  %v1014_v35 = vsel %vm366_vm1, %v1006_v37, %v2604_v46 }
 0x5f7   : > { %v2196_v27 = vpop.eup %2195  ;;  %v1029_v40 = vsel %vm411_vm2, %v1014_v35, 0 }
 0x5f8   : > { %v863_v23 = vpop.xlane.xlu0 %862  ;;  %v873_v24 = vmul.f32 %v2196_v27, %v2180_v63  ;;  %v881_v32 = vpack.c.bf16 %v875_v22, %v874_v29 }
 0x5f9   : > { %2197 = vrcp.f32 %v863_v23 }
 0x5fa   : > { %v880_v31 = vpack.c.bf16 %v873_v24, %v872_v30  ;;  %2199 = vrcp.f32 %v854_v28 }
 0x5fb   : > { %2201 = vrcp.f32 %v860_v18 }
 0x5fc   : > { %1989 = vmatprep.mubr.msk.bf16.mxu1 %vm493_vm3, %v880_v31  ;;  %v1004_v33 = vpop.permute.xlu0 %1003 }
 0x5fd   : > { %v1012_v36 = vsel %vm366_vm1, %v1004_v33, %v2602_v45  ;;  %1990 = vmatmul.mubr.msk.bf16.vlgmr.msra.gmra.mrb[8].mxu1 %vm493_vm3, %v881_v32  ;;  %v1016_v45 = vsel %vm366_vm1, %v1008_v39, %v2614_v49 }
 0x5fe   : > { %1998 = vmatpush3.bf16.xpose.msra.mxu1 %v1025_v34  ;;  %v1027_v38 = vsel %vm411_vm2, %v1012_v36, 0  ;;  %v1031_v42 = vsel %vm411_vm2, %v1016_v45, 0 }
 0x5ff   : > { %2070 = vmatprep.subr.msk.bf16.mxu1 %vm411_vm2, %v1012_v36 }
 0x600   : > { %v2720_v60 = vpop.permute.xlu0 %973 }
 0x603   : > { %v2198_v46 = vpop.eup %2197 }
 0x604   : > { %v2200_v44 = vpop.eup %2199  ;;  %v879_v59 = vmul.f32 %v2198_v46, %v2674_v8  ;;  %v2728_v4 = vpop.permute.xlu0 %975 }
 0x605   : > { %v2202_v47 = vpop.eup %2201  ;;  %v876_v49 = vmul.f32 %v2200_v44, %v2670_v5 }
 0x606   : > { %2000 = vmatpush3.bf16.xpose.msra.mxu1 %v1027_v38  ;;  %v878_v62 = vmul.f32 %v2202_v47, %v2665_v3 }
 0x607   : > { %2071 = vmatprep.subr.msk.bf16.mxu1 %vm411_vm2, %v1014_v35 }
 0x608   : > { %v883_v0 = vpack.c.bf16 %v879_v59, %v878_v62  ;;  %v2731_v8 = vpop.permute.xlu0 %977 }
 0x60c   : > { %v2739_v9 = vpop.permute.xlu0 %979 }
 0x60e   : > { %2002 = vmatpush3.bf16.xpose.msra.mxu1 %v1029_v40 }
 0x60f   : > { %2072 = vmatprep.subr.msk.bf16.mxu1 %vm411_vm2, %v1016_v45 }
 0x616   : > { %2004 = vmatpush3.bf16.xpose.msra.mxu1 %v1031_v42 }
 0x61d   : > { %v857_v43 = vpop.xlane.xlu1 %856 }
 0x61e   : > { %2203 = vrcp.f32 %v857_v43 }
 0x621   : > { %v982_v48 = vpop.permute.xlu1 %981 }
 0x622   : > { %v991_v2 = vsel %vm366_vm1, %v2720_v60, %v982_v48 }
 0x625   : > { %v984_v1 = vpop.permute.xlu1 %983 }
 0x626   : > { %v994_v3 = vsel %vm366_vm1, %v2728_v4, %v984_v1 }
 0x628   : > { %v2204_v50 = vpop.eup %2203 }
 0x629   : > { %v877_v61 = vmul.f32 %v2204_v50, %v2188_v11  ;;  %v986_v6 = vpop.permute.xlu1 %985 }
 0x62a   : > { %v997_v5 = vsel %vm366_vm1, %v2731_v8, %v986_v6 }
 0x62b   : > { %v882_v63 = vpack.c.bf16 %v877_v61, %v876_v49 }
 0x62d   : > { %1993 = vmatprep.mubr.msk.bf16.mxu1 %vm493_vm3, %v882_v63  ;;  %v988_v41 = vpop.permute.xlu1 %987 }
 0x62e   : > { %1994 = vmatmul.mubr.msk.bf16.gmra.mrb[12].mxu1 %vm493_vm3, %v883_v0  ;;  %v1000_v10 = vsel %vm366_vm1, %v2739_v9, %v988_v41 }
 0x62f   : > { %2005 = vmatprep.mubr.msk.bf16.mxu1 %vm411_vm2, %v991_v2 }
 0x636   : > { %2006 = vmatmul.mubr.msk.bf16.vlgmr.msra.gmra.mrb[16].mxu1 %vm411_vm2, %v994_v3 }
 0x637   : > { %2009 = vmatprep.mubr.msk.bf16.mxu1 %vm411_vm2, %v997_v5 }
 0x63e   : > { %2010 = vmatmul.mubr.msk.bf16.gmra.mrb[20].mxu1 %vm411_vm2, %v1000_v10 }
 0x6d0   : > { %v2744_v11 = vpop.f32.mrb[8].mxu1 }
 0x6d1   : > { %v2746_v12 = vpop.f32.mrb[9].mxu1 }
 0x6d2   : > { %v2748_v7 = vpop.f32.mrb[10].mxu1 }
 0x6d3   : > { %v2750_v13 = vpop.f32.mrb[11].mxu1 }
 0x701   : > { %v2752_v14 = vpop.f32.mrb[12].mxu1 }
 0x702   : > { %v2754_v17 = vpop.f32.mrb[13].mxu1 }
 0x703   : > { %v2756_v18 = vpop.f32.mrb[14].mxu1 }
 0x704   : > { %v2758_v19 = vpop.f32.mrb[15].mxu1 }
 0x709   : > { %v2007_v28 = vpop.f32.mrb[16].mxu1 }
 0x70a   : > { %v1067_v20 = vpop.f32.mrb[17].mxu1  ;;  %v1104_v21 = vsel %vm493_vm3, %v2007_v28, -inf }
 0x70b   : > { %1105 = vmax.xlane.f32.xlu0 %v1104_v21  ;;  %v2008_v27 = vpop.f32.mrb[18].mxu1  ;;  %v1098_v30 = vsel %vm493_vm3, %v1067_v20, -inf }
 0x70c   : > { %v1070_v22 = vpop.f32.mrb[19].mxu1  ;;  %v1107_v31 = vsel %vm493_vm3, %v2008_v27, -inf }
 0x70d   : > { %v1101_v23 = vsel %vm493_vm3, %v1070_v22, -inf }
 0x70e   : > { %1102 = vmax.xlane.f32.xlu1 %v1101_v23 }
 0x70f   : > { %1099 = vmax.xlane.f32.xlu0 %v1098_v30 }
 0x711   : > { %v2011_v24 = vpop.f32.mrb[20].mxu1 }
 0x712   : > { %v1083_v29 = vpop.f32.mrb[21].mxu1  ;;  %v1116_v32 = vsel %vm493_vm3, %v2011_v24, -inf }
 0x713   : > { %1108 = vmax.xlane.f32.xlu0 %v1107_v31  ;;  %1117 = vmax.xlane.f32.xlu1 %v1116_v32  ;;  %v2012_v33 = vpop.f32.mrb[22].mxu1  ;;  %v1110_v37 = vsel %vm493_vm3, %v1083_v29, -inf }
 0x714   : > { %v2765_v34 = vpop.f32.mrb[23].mxu1  ;;  %v1119_v38 = vsel %vm493_vm3, %v2012_v33, -inf }
 0x715   : > { %v1113_v36 = vsel %vm493_vm3, %v2765_v34, -inf }
 0x717   : > { %1111 = vmax.xlane.f32.xlu1 %v1110_v37  ;;  %1114 = vmax.xlane.f32.xlu0 %v1113_v36 }
 0x71b   : > { %1120 = vmax.xlane.f32.xlu0 %v1119_v38 }
 0x728   : > { %1190 = vrot.lane.b32.xlu1 %v2446_v16, %s2345_s11 }
 0x72c   : > { %1194 = vrot.lane.b32.xlu1 %v2456_v26, %s2345_s11 }
 0x730   : > { %1196 = vrot.lane.b32.xlu1 %v2454_v25, %s2345_s11 }
 0x731   : > { %1192 = vrot.lane.b32.xlu0 %v2444_v15, %s2345_s11 }
 0x734   : > { %1307 = vrot.lane.b32.xlu1 %v2446_v16, %s2346_s12 }
 0x798   : > { %v1106_v35 = vpop.xlane.xlu0 %1105 }
 0x799   : > { %v1124_v39 = vsub.f32 %v2007_v28, %v1106_v35 }
 0x79b   : > { %v1134_v40 = vmul.f32 1.442695, %v1124_v39  ;;  %v1103_v45 = vpop.xlane.xlu1 %1102 }
 0x79c   : > { %v1100_v42 = vpop.xlane.xlu0 %1099  ;;  %v1123_v44 = vsub.f32 %v1070_v22, %v1103_v45 }
 0x79d   : > { %2205 = vpow2.f32 %v1134_v40  ;;  %v1122_v43 = vsub.f32 %v1067_v20, %v1100_v42 }
 0x79e   : > { %v1132_v49 = vmul.f32 1.442695, %v1123_v44  ;;  %v2271_v44 = vld [vmem:[%s3061_s3 + $0x10] sm:$0xff]  }
 0x79f   : > { %v1130_v46 = vmul.f32 1.442695, %v1122_v43 }
 0x7a0   : > { %v1118_v47 = vpop.xlane.xlu1 %1117  ;;  %v1109_v48 = vpop.xlane.xlu0 %1108 }
 0x7a1   : > { %2207 = vpow2.f32 %v1130_v46  ;;  %v1125_v50 = vsub.f32 %v2008_v27, %v1109_v48  ;;  %v1128_v61 = vsub.f32 %v2011_v24, %v1118_v47  ;;  %v2270_v46 = vld [vmem:[%s3061_s3 + $0x8] sm:$0xff]   ;;  %v2272_v47 = vld [vmem:[%s3061_s3 + $0x18] sm:$0xff]  }
 0x7a3   : > { %v1136_v59 = vmul.f32 1.442695, %v1125_v50  ;;  %v1142_v1 = vmul.f32 1.442695, %v1128_v61 }
 0x7a4   : > { %v1112_v62 = vpop.xlane.xlu1 %1111  ;;  %v1115_v63 = vpop.xlane.xlu0 %1114 }
 0x7a5   : > { %2209 = vpow2.f32 %v1136_v59  ;;  %v1126_v2 = vsub.f32 %v1083_v29, %v1112_v62  ;;  %v1127_v40 = vsub.f32 %v2765_v34, %v1115_v63  ;;  %v2269_v34 = vld [vmem:[%s3061_s3] sm:$0xff]  }
 0x7a6   : > { %2211 = vpow2.f32 %v1132_v49 }
 0x7a7   : > { %v2777_v0 = vpop.eup %2205  ;;  %2213 = vpow2.f32 %v1142_v1  ;;  %v1138_v10 = vmul.f32 1.442695, %v1126_v2  ;;  %v1140_v45 = vmul.f32 1.442695, %v1127_v40 }
 0x7a8   : > { %v1191_v6 = vpop.permute.xlu1 %1190  ;;  %v1121_v3 = vpop.xlane.xlu0 %1120  ;;  %v1152_v5 = vsel %vm493_vm3, %v2777_v0, 0.0 }
 0x7a9   : > { %2013 = vmatprep.subr.bf16.mxu0 %v1191_v6  ;;  %1153 = vadd.xlane.f32.xlu1 %v1152_v5  ;;  %v1129_v28 = vsub.f32 %v2012_v33, %v1121_v3  ;;  %2215 = vpow2.f32 %v1138_v10 }
 0x7aa   : > { %2014 = vmatpush3.bf16.msra.mxu0 %v1191_v6 }
 0x7ab   : > { %v2781_v41 = vpop.eup %2207  ;;  %v1144_v23 = vmul.f32 1.442695, %v1129_v28 }
 0x7ac   : > { %v1195_v20 = vpop.permute.xlu1 %1194  ;;  %v1193_v21 = vpop.permute.xlu0 %1192  ;;  %v1146_v27 = vsel %vm493_vm3, %v2781_v41, 0.0 }
 0x7ad   : > { %1147 = vadd.xlane.f32.xlu1 %v1146_v27  ;;  %2015 = vmatprep.subr.bf16.mxu0 %v1193_v21  ;;  %2217 = vpow2.f32 %v1144_v23 }
 0x7ae   : > { %2016 = vmatpush3.bf16.msra.mxu0 %v1193_v21  ;;  %2219 = vpow2.f32 %v1140_v45 }
 0x7af   : > { %2017 = vmatprep.subr.bf16.mxu0 %v1195_v20  ;;  %v2210_v22 = vpop.eup %2209 }
 0x7b0   : > { %v1197_v30 = vpop.permute.xlu1 %1196  ;;  %v1155_v24 = vsel %vm493_vm3, %v2210_v22, 0.0  ;;  %v2212_v29 = vpop.eup %2211 }
 0x7b1   : > { %1156 = vadd.xlane.f32.xlu0 %v1155_v24  ;;  %v1149_v33 = vsel %vm493_vm3, %v2212_v29, 0.0  ;;  %v2789_v36 = vpop.eup %2213 }
 0x7b2   : > { %2018 = vmatpush3.bf16.msra.mxu0 %v1195_v20  ;;  %v1164_v37 = vsel %vm493_vm3, %v2789_v36, 0.0 }
 0x7b3   : > { %2019 = vmatprep.subr.bf16.mxu0 %v1197_v30  ;;  %v2794_v38 = vpop.eup %2215 }
 0x7b4   : > { %v1308_v31 = vpop.permute.xlu1 %1307  ;;  %v1158_v35 = vsel %vm493_vm3, %v2794_v38, 0.0 }
 0x7b5   : > { %v1316_v32 = vsel %vm366_vm1, %v1308_v31, %v2720_v60  ;;  %1150 = vadd.xlane.f32.xlu0 %v1149_v33 }
 0x7b6   : > { %2020 = vmatpush3.bf16.msra.mxu0 %v1197_v30  ;;  %v1331_v30 = vsel %vm411_vm2, %v1316_v32, 0 }
 0x7b7   : > { %2073 = vmatprep.subr.msk.bf16.mxu0 %vm411_vm2, %v1316_v32  ;;  %v2798_v39 = vpop.eup %2217 }
 0x7b8   : > { %v1167_v60 = vsel %vm493_vm3, %v2798_v39, 0.0  ;;  %v2811_v42 = vpop.eup %2219 }
 0x7b9   : > { %1165 = vadd.xlane.f32.xlu0 %v1164_v37  ;;  %v1161_v43 = vsel %vm493_vm3, %v2811_v42, 0.0 }
 0x7bd   : > { %1159 = vadd.xlane.f32.xlu0 %v1158_v35 }
 0x7be   : > { %1311 = vrot.lane.b32.xlu1 %v2456_v26, %s2346_s12 }
 0x7c1   : > { %1168 = vadd.xlane.f32.xlu0 %v1167_v60 }
 0x7c2   : > { %1313 = vrot.lane.b32.xlu1 %v2454_v25, %s2346_s12 }
 0x7d7   : > { %1309 = vrot.lane.b32.xlu0 %v2444_v15, %s2346_s12  ;;  %s1850_s12 = sshll.u32 %s2399_s19, 10 }
 0x7d8   : > { %s3004_s22 = scalar_lea.hbm %s3062_s4, %s1850_s12 }
 0x7db   : > { %1279 = vrot.lane.b32.xlu0 %v2446_v16, %s2347_s14 }
 0x7df   : > { %1281 = vrot.lane.b32.xlu0 %v2444_v15, %s2347_s14 }
 0x7e3   : > { %1283 = vrot.lane.b32.xlu0 %v2456_v26, %s2347_s14 }
 0x7e6   : > { %1162 = vadd.xlane.f32.xlu1 %v1161_v43 }
 0x7e7   : > { %1285 = vrot.lane.b32.xlu0 %v2454_v25, %s2347_s14 }
 0x7f7   : > { %1287 = vrot.lane.b32.xlu1 %v2269_v34, %s2344_s10 }
 0x7fb   : > { %1289 = vrot.lane.b32.xlu1 %v2270_v46, %s2344_s10 }
 0x7ff   : > { %1291 = vrot.lane.b32.xlu1 %v2271_v44, %s2344_s10 }
 0x803   : > { %1293 = vrot.lane.b32.xlu1 %v2272_v47, %s2344_s10  ;;  %s1794_s10 = sshll.u32 %s188_s9, 6 }
 0x804   : > { %s2962_s11 = scalar_lea.vmem [#allocation2], %s1794_s10 }
 0x805   : > { %s1728_s14 = sshll.u32 %s2962_s11, 4  ;;  %s3009_s14 = int_to_ptr.vmem [resolvable:$true] %s1728_s14 }
 0x806   : > { %s2273_s27 = scalar_lea.vmem %s3009_s14, 1024  ;;  %p2280_p0 = scmp.lt.s32.totalorder %s3009_s14, %s2278_s29 }
 0x807   : > { %p2274_p11 = scmp.ne.s32.totalorder %s3009_s14, %s2273_s27  ;;  %p2281_p1 = scmp.lt.s32.totalorder %s2279_s30, %s2273_s27 }
 0x809   : > { %p2275_p12 = pnand %p2274_p11, %p2416_p5  ;;  %p2282_p2 = por %p2281_p1, %p2280_p0 }
 0x80b   : > { %p2276_p13 = pneg %p2275_p12 }
 0x80d   : > { %p2283_p3 = pnand %p2282_p2, %p2276_p13 }
 0x836   : > { %v1154_v48 = vpop.xlane.xlu1 %1153 }
 0x83a   : > { %v1148_v50 = vpop.xlane.xlu1 %1147 }
 0x83e   : > { %v1157_v59 = vpop.xlane.xlu0 %1156 }
 0x83f   : > { %2221 = vrcp.f32 %v1157_v59 }
 0x840   : > { %2223 = vrcp.f32 %v1148_v50 }
 0x841   : > { %2225 = vrcp.f32 %v1154_v48 }
 0x842   : > { %v1151_v49 = vpop.xlane.xlu0 %1150 }
 0x843   : > { %2227 = vrcp.f32 %v1151_v49 }
 0x846   : > { %v1166_v61 = vpop.xlane.xlu0 %1165 }
 0x849   : > { %v2222_v62 = vpop.eup %2221 }
 0x84a   : > { %v1160_v63 = vpop.xlane.xlu0 %1159  ;;  %v2224_v1 = vpop.eup %2223  ;;  %v1181_v3 = vmul.f32 %v2222_v62, %v2210_v22 }
 0x84b   : > { %v2226_v2 = vpop.eup %2225  ;;  %v1178_v10 = vmul.f32 %v2224_v1, %v2781_v41  ;;  %v1312_v22 = vpop.permute.xlu1 %1311 }
 0x84c   : > { %v1180_v20 = vmul.f32 %v2226_v2, %v2777_v0  ;;  %v1320_v0 = vsel %vm366_vm1, %v1312_v22, %v2731_v8 }
 0x84d   : > { %v2228_v6 = vpop.eup %2227  ;;  %v1335_v31 = vsel %vm411_vm2, %v1320_v0, 0 }
 0x84e   : > { %v1169_v5 = vpop.xlane.xlu0 %1168  ;;  %v1179_v28 = vmul.f32 %v2228_v6, %v2212_v29  ;;  %v1187_v27 = vpack.c.bf16 %v1181_v3, %v1180_v20 }
 0x84f   : > { %v1314_v29 = vpop.permute.xlu1 %1313  ;;  %2229 = vrcp.f32 %v1169_v5 }
 0x850   : > { %v1186_v21 = vpack.c.bf16 %v1179_v28, %v1178_v10  ;;  %2231 = vrcp.f32 %v1160_v63 }
 0x851   : > { %2233 = vrcp.f32 %v1166_v61 }
 0x852   : > { %2021 = vmatprep.mubr.msk.bf16.mxu0 %vm493_vm3, %v1186_v21  ;;  %v1310_v23 = vpop.permute.xlu0 %1309 }
 0x853   : > { %v1318_v24 = vsel %vm366_vm1, %v1310_v23, %v2728_v4  ;;  %2022 = vmatmul.mubr.msk.bf16.vlgmr.msra.gmra.mrb[24].mxu0 %vm493_vm3, %v1187_v27  ;;  %v1322_v4 = vsel %vm366_vm1, %v1314_v29, %v2739_v9 }
 0x854   : > { %2030 = vmatpush3.bf16.xpose.msra.mxu0 %v1331_v30  ;;  %v1333_v41 = vsel %vm411_vm2, %v1318_v24, 0  ;;  %v1337_v32 = vsel %vm411_vm2, %v1322_v4, 0 }
 0x855   : > { %2074 = vmatprep.subr.msk.bf16.mxu0 %vm411_vm2, %v1318_v24 }
 0x856   : > { %v1280_v43 = vpop.permute.xlu0 %1279 }
 0x859   : > { %v2230_v8 = vpop.eup %2229 }
 0x85a   : > { %v2232_v37 = vpop.eup %2231  ;;  %v1185_v45 = vmul.f32 %v2230_v8, %v2798_v39  ;;  %v1282_v59 = vpop.permute.xlu0 %1281 }
 0x85b   : > { %v2234_v35 = vpop.eup %2233  ;;  %v1182_v9 = vmul.f32 %v2232_v37, %v2794_v38 }
 0x85c   : > { %2032 = vmatpush3.bf16.xpose.msra.mxu0 %v1333_v41  ;;  %v1184_v46 = vmul.f32 %v2234_v35, %v2789_v36 }
 0x85d   : > { %2075 = vmatprep.subr.msk.bf16.mxu0 %vm411_vm2, %v1320_v0 }
 0x85e   : > { %v1189_v47 = vpack.c.bf16 %v1185_v45, %v1184_v46  ;;  %v1284_v49 = vpop.permute.xlu0 %1283 }
 0x862   : > { %v1286_v61 = vpop.permute.xlu0 %1285 }
 0x864   : > { %2034 = vmatpush3.bf16.xpose.msra.mxu0 %v1335_v31 }
 0x865   : > { %2076 = vmatprep.subr.msk.bf16.mxu0 %vm411_vm2, %v1322_v4 }
 0x86c   : > { %2036 = vmatpush3.bf16.xpose.msra.mxu0 %v1337_v32 }
 0x873   : > { %v1163_v33 = vpop.xlane.xlu1 %1162 }
 0x874   : > { %2235 = vrcp.f32 %v1163_v33 }
 0x877   : > { %v1288_v60 = vpop.permute.xlu1 %1287 }
 0x878   : > { %v1297_v50 = vsel %vm366_vm1, %v1280_v43, %v1288_v60 }
 0x87b   : > { %v1290_v48 = vpop.permute.xlu1 %1289 }
 0x87c   : > { %v1300_v38 = vsel %vm366_vm1, %v1282_v59, %v1290_v48 }
 0x87e   : > { %v2236_v40 = vpop.eup %2235 }
 0x87f   : > { %v1183_v34 = vmul.f32 %v2236_v40, %v2811_v42  ;;  %v1292_v39 = vpop.permute.xlu1 %1291 }
 0x880   : > { %v1303_v42 = vsel %vm366_vm1, %v1284_v49, %v1292_v39 }
 0x881   : > { %v1188_v44 = vpack.c.bf16 %v1183_v34, %v1182_v9 }
 0x883   : > { %2025 = vmatprep.mubr.msk.bf16.mxu0 %vm493_vm3, %v1188_v44  ;;  %v1294_v36 = vpop.permute.xlu1 %1293 }
 0x884   : > { %2026 = vmatmul.mubr.msk.bf16.gmra.mrb[28].mxu0 %vm493_vm3, %v1189_v47  ;;  %v1306_v62 = vsel %vm366_vm1, %v1286_v61, %v1294_v36 }
 0x885   : > { %2037 = vmatprep.mubr.msk.bf16.mxu0 %vm411_vm2, %v1297_v50 }
 0x88c   : > { %2038 = vmatmul.mubr.msk.bf16.vlgmr.msra.gmra.mrb[32].mxu0 %vm411_vm2, %v1300_v38 }
 0x88d   : > { %2041 = vmatprep.mubr.msk.bf16.mxu0 %vm411_vm2, %v1303_v42 }
 0x894   : > { %2042 = vmatmul.mubr.msk.bf16.gmra.mrb[36].mxu0 %vm411_vm2, %v1306_v62 }
 0x926   : > { %v2864_v63 = vpop.f32.mrb[24].mxu0 }
 0x927   : > { %v2866_v1 = vpop.f32.mrb[25].mxu0 }
 0x928   : > { %v2868_v2 = vpop.f32.mrb[26].mxu0 }
 0x929   : > { %v2870_v6 = vpop.f32.mrb[27].mxu0 }
 0x957   : > { %v2872_v3 = vpop.f32.mrb[28].mxu0 }
 0x958   : > { %v2874_v5 = vpop.f32.mrb[29].mxu0 }
 0x959   : > { %v2876_v10 = vpop.f32.mrb[30].mxu0 }
 0x95a   : > { %v2878_v28 = vpop.f32.mrb[31].mxu0 }
 0x95f   : > { %v2039_v20 = vpop.f32.mrb[32].mxu0 }
 0x960   : > { %v1373_v21 = vpop.f32.mrb[33].mxu0  ;;  %v1410_v22 = vsel %vm493_vm3, %v2039_v20, -inf }
 0x961   : > { %v2040_v27 = vpop.f32.mrb[34].mxu0  ;;  %v1404_v23 = vsel %vm493_vm3, %v1373_v21, -inf }
 0x962   : > { %1405 = vmax.xlane.f32.xlu0 %v1404_v23  ;;  %v1376_v30 = vpop.f32.mrb[35].mxu0  ;;  %v1413_v31 = vsel %vm493_vm3, %v2040_v27, -inf }
 0x963   : > { %v1407_v24 = vsel %vm493_vm3, %v1376_v30, -inf }
 0x964   : > { %1408 = vmax.xlane.f32.xlu1 %v1407_v24 }
 0x966   : > { %1411 = vmax.xlane.f32.xlu0 %v1410_v22 }
 0x967   : > { %v2043_v41 = vpop.f32.mrb[36].mxu0 }
 0x968   : > { %v1389_v0 = vpop.f32.mrb[37].mxu0  ;;  %v1422_v8 = vsel %vm493_vm3, %v2043_v41, -inf }
 0x969   : > { %v2044_v29 = vpop.f32.mrb[38].mxu0  ;;  %v1416_v4 = vsel %vm493_vm3, %v1389_v0, -inf }
 0x96a   : > { %1414 = vmax.xlane.f32.xlu0 %v1413_v31  ;;  %1417 = vmax.xlane.f32.xlu1 %v1416_v4  ;;  %v1392_v32 = vpop.f32.mrb[39].mxu0  ;;  %v1425_v37 = vsel %vm493_vm3, %v2044_v29, -inf }
 0x96b   : > { %v1419_v33 = vsel %vm493_vm3, %v1392_v32, -inf }
 0x96e   : > { %1423 = vmax.xlane.f32.xlu1 %v1422_v8  ;;  %1420 = vmax.xlane.f32.xlu0 %v1419_v33 }
 0x972   : > { %1426 = vmax.xlane.f32.xlu0 %v1425_v37 }
 0x97f   : > { %1496 = vrot.lane.b32.xlu1 %v2446_v16, %s2348_s6 }
 0x9ef   : > { %v1406_v35 = vpop.xlane.xlu0 %1405 }
 0x9f0   : > { %v1428_v60 = vsub.f32 %v1373_v21, %v1406_v35 }
 0x9f1   : > { %v1409_v40 = vpop.xlane.xlu1 %1408 }
 0x9f2   : > { %v1436_v9 = vmul.f32 1.442695, %v1428_v60  ;;  %v1429_v46 = vsub.f32 %v1376_v30, %v1409_v40 }
 0x9f3   : > { %v1412_v45 = vpop.xlane.xlu0 %1411 }
 0x9f4   : > { %v1430_v43 = vsub.f32 %v2039_v20, %v1412_v45  ;;  %v1438_v39 = vmul.f32 1.442695, %v1429_v46 }
 0x9f6   : > { %v1440_v34 = vmul.f32 1.442695, %v1430_v43 }
 0x9f7   : > { %v1418_v44 = vpop.xlane.xlu1 %1417  ;;  %v1415_v47 = vpop.xlane.xlu0 %1414 }
 0x9f8   : > { %2237 = vpow2.f32 %v1440_v34  ;;  %v1431_v48 = vsub.f32 %v2040_v27, %v1415_v47  ;;  %v1432_v50 = vsub.f32 %v1389_v0, %v1418_v44 }
 0x9f9   : > { %2239 = vpow2.f32 %v1436_v9 }
 0x9fa   : > { %v1442_v59 = vmul.f32 1.442695, %v1431_v48  ;;  %v1444_v16 = vmul.f32 1.442695, %v1432_v50 }
 0x9fb   : > { %v1424_v49 = vpop.xlane.xlu1 %1423  ;;  %v1421_v38 = vpop.xlane.xlu0 %1420 }
 0x9fc   : > { %v1434_v42 = vsub.f32 %v2043_v41, %v1424_v49  ;;  %2241 = vpow2.f32 %v1442_v59  ;;  %v1433_v61 = vsub.f32 %v1392_v32, %v1421_v38 }
 0x9fd   : > { %2243 = vpow2.f32 %v1438_v39 }
 0x9fe   : > { %v1448_v36 = vmul.f32 1.442695, %v1434_v42  ;;  %v1446_v30 = vmul.f32 1.442695, %v1433_v61 }
 0x9ff   : > { %v1497_v62 = vpop.permute.xlu1 %1496  ;;  %v1427_v20 = vpop.xlane.xlu0 %1426 }
 0xa00   : > { %2245 = vpow2.f32 %v1448_v36  ;;  %v1435_v21 = vsub.f32 %v2044_v29, %v1427_v20  ;;  %2045 = vmatprep.subr.bf16.mxu1 %v1497_v62 }
 0xa01   : > { %2046 = vmatpush3.bf16.msra.mxu1 %v1497_v62  ;;  %2247 = vpow2.f32 %v1444_v16 }
 0xa02   : > { %v2890_v23 = vpop.eup %2237  ;;  %v1450_v27 = vmul.f32 1.442695, %v1435_v21 }
 0xa03   : > { %v1458_v24 = vsel %vm493_vm3, %v2890_v23, 0.0  ;;  %v2240_v22 = vpop.eup %2239 }
 0xa04   : > { %2249 = vpow2.f32 %v1450_v27  ;;  %1459 = vadd.xlane.f32.xlu1 %v1458_v24  ;;  %v1452_v0 = vsel %vm493_vm3, %v2240_v22, 0.0 }
 0xa05   : > { %2251 = vpow2.f32 %v1446_v30 }
 0xa06   : > { %v2894_v41 = vpop.eup %2241 }
 0xa07   : > { %v1461_v29 = vsel %vm493_vm3, %v2894_v41, 0.0  ;;  %v2244_v31 = vpop.eup %2243 }
 0xa08   : > { %1453 = vadd.xlane.f32.xlu1 %v1452_v0  ;;  %1462 = vadd.xlane.f32.xlu0 %v1461_v29  ;;  %v1455_v8 = vsel %vm493_vm3, %v2244_v31, 0.0 }
 0xa0a   : > { %v2899_v4 = vpop.eup %2245 }
 0xa0b   : > { %v1470_v32 = vsel %vm493_vm3, %v2899_v4, 0.0  ;;  %v2903_v33 = vpop.eup %2247 }
 0xa0c   : > { %1471 = vadd.xlane.f32.xlu1 %v1470_v32  ;;  %1456 = vadd.xlane.f32.xlu0 %v1455_v8  ;;  %v1464_v35 = vsel %vm493_vm3, %v2903_v33, 0.0 }
 0xa0e   : > { %v2906_v37 = vpop.eup %2249 }
 0xa0f   : > { %v1473_v60 = vsel %vm493_vm3, %v2906_v37, 0.0  ;;  %v2252_v40 = vpop.eup %2251 }
 0xa10   : > { %1465 = vadd.xlane.f32.xlu1 %v1464_v35  ;;  %1474 = vadd.xlane.f32.xlu0 %v1473_v60  ;;  %v1467_v45 = vsel %vm493_vm3, %v2252_v40, 0.0 }
 0xa14   : > { %1468 = vadd.xlane.f32.xlu0 %v1467_v45 }
 0xa21   : > { %1500 = vrot.lane.b32.xlu1 %v2456_v26, %s2348_s6 }
 0xa25   : > { %1502 = vrot.lane.b32.xlu1 %v2454_v25, %s2348_s6 }
 0xa29   : > { %1595 = vrot.lane.b32.xlu1 %v2750_v13, %s2338_s13 }
 0xa2a   : > { %1498 = vrot.lane.b32.xlu0 %v2444_v15, %s2348_s6 }
 0xa2d   : > { %1599 = vrot.lane.b32.xlu1 %v2748_v7, %s2338_s13 }
 0xa2e   : > { %1593 = vrot.lane.b32.xlu0 %v2746_v12, %s2338_s13 }
 0xa31   : > { %1603 = vrot.lane.b32.xlu1 %v2758_v19, %s2338_s13 }
 0xa32   : > { %1597 = vrot.lane.b32.xlu0 %v2744_v11, %s2338_s13 }
 0xa35   : > { %1607 = vrot.lane.b32.xlu1 %v2756_v18, %s2338_s13 }
 0xa36   : > { %1601 = vrot.lane.b32.xlu0 %v2754_v17, %s2338_s13 }
 0xa39   : > { %1627 = vrot.lane.b32.xlu1 %v2870_v6, %s2349_s7 }
 0xa3a   : > { %1605 = vrot.lane.b32.xlu0 %v2752_v14, %s2338_s13 }
 0xa3d   : > { %1631 = vrot.lane.b32.xlu1 %v2868_v2, %s2349_s7 }
 0xa3e   : > { %1625 = vrot.lane.b32.xlu0 %v2866_v1, %s2349_s7 }
 0xa41   : > { %1635 = vrot.lane.b32.xlu1 %v2878_v28, %s2349_s7 }
 0xa42   : > { %1629 = vrot.lane.b32.xlu0 %v2864_v63, %s2349_s7 }
 0xa45   : > { %1639 = vrot.lane.b32.xlu1 %v2876_v10, %s2349_s7 }
 0xa46   : > { %1633 = vrot.lane.b32.xlu0 %v2874_v5, %s2349_s7 }
 0xa4a   : > { %1637 = vrot.lane.b32.xlu0 %v2872_v3, %s2349_s7 }
 0xa91   : > { %v1460_v15 = vpop.xlane.xlu1 %1459 }
 0xa95   : > { %v1454_v25 = vpop.xlane.xlu1 %1453  ;;  %v1463_v26 = vpop.xlane.xlu0 %1462 }
 0xa96   : > { %2253 = vrcp.f32 %v1454_v25 }
 0xa99   : > { %v1472_v11 = vpop.xlane.xlu1 %1471  ;;  %v1457_v12 = vpop.xlane.xlu0 %1456 }
 0xa9a   : > { %2255 = vrcp.f32 %v1457_v12 }
 0xa9b   : > { %2257 = vrcp.f32 %v1463_v26 }
 0xa9c   : > { %2259 = vrcp.f32 %v1460_v15 }
 0xa9d   : > { %v1475_v7 = vpop.xlane.xlu0 %1474  ;;  %v1466_v13 = vpop.xlane.xlu1 %1465 }
 0xa9e   : > { %2261 = vrcp.f32 %v1466_v13 }
 0xaa0   : > { %v2254_v17 = vpop.eup %2253 }
 0xaa1   : > { %v1469_v14 = vpop.xlane.xlu0 %1468  ;;  %v1501_v19 = vpop.permute.xlu1 %1500  ;;  %v1484_v1 = vmul.f32 %v2254_v17, %v2240_v22 }
 0xaa2   : > { %2263 = vrcp.f32 %v1469_v14 }
 0xaa3   : > { %2265 = vrcp.f32 %v1475_v7 }
 0xaa4   : > { %v2256_v18 = vpop.eup %2255  ;;  %2267 = vrcp.f32 %v1472_v11 }
 0xaa5   : > { %v1499_v63 = vpop.permute.xlu0 %1498  ;;  %v1485_v2 = vmul.f32 %v2256_v18, %v2244_v31  ;;  %v2258_v3 = vpop.eup %2257 }
 0xaa6   : > { %2047 = vmatprep.subr.bf16.mxu1 %v1499_v63  ;;  %v2260_v5 = vpop.eup %2259  ;;  %v1503_v28 = vpop.permute.xlu1 %1502  ;;  %v1487_v9 = vmul.f32 %v2258_v3, %v2894_v41 }
 0xaa7   : > { %2048 = vmatpush3.bf16.msra.mxu1 %v1499_v63  ;;  %v1492_v6 = vpack.c.bf16 %v1485_v2, %v1484_v1  ;;  %v1486_v46 = vmul.f32 %v2260_v5, %v2890_v23 }
 0xaa8   : > { %2049 = vmatprep.subr.bf16.mxu1 %v1501_v19  ;;  %v2262_v10 = vpop.eup %2261 }
 0xaa9   : > { %2053 = vmatprep.mubr.msk.bf16.mxu1 %vm493_vm3, %v1492_v6  ;;  %v1488_v44 = vmul.f32 %v2262_v10, %v2903_v33  ;;  %v1493_v47 = vpack.c.bf16 %v1487_v9, %v1486_v46  ;;  %v1594_v27 = vpop.permute.xlu0 %1593 }
 0xaaa   : > { %v1596_v30 = vpop.permute.xlu1 %1595 }
 0xaab   : > { %2050 = vmatpush3.bf16.msra.mxu1 %v1501_v19  ;;  %v1682_v17 = vsel %vm366_vm1, %v2626_v54, %v1596_v30 }
 0xaac   : > { %v2264_v43 = vpop.eup %2263  ;;  %2051 = vmatprep.subr.bf16.mxu1 %v1503_v28 }
 0xaad   : > { %v1489_v34 = vmul.f32 %v2264_v43, %v2252_v40  ;;  %v2266_v48 = vpop.eup %2265  ;;  %v1598_v24 = vpop.permute.xlu0 %1597 }
 0xaae   : > { %v2268_v59 = vpop.eup %2267  ;;  %v1491_v39 = vmul.f32 %v2266_v48, %v2906_v37  ;;  %v1600_v22 = vpop.permute.xlu1 %1599  ;;  %v1683_v45 = vsel %vm366_vm1, %v2620_v51, %v1598_v24  ;;  %v1681_v51 = vsel %vm366_vm1, %v2622_v52, %v1594_v27 }
 0xaaf   : > { %2052 = vmatpush3.bf16.msra.mxu1 %v1503_v28  ;;  %v1494_v50 = vpack.c.bf16 %v1489_v34, %v1488_v44  ;;  %v1490_v49 = vmul.f32 %v2268_v59, %v2899_v4  ;;  %v1684_v26 = vsel %vm366_vm1, %v2624_v53, %v1600_v22 }
 0xab1   : > { %v1495_v38 = vpack.c.bf16 %v1491_v39, %v1490_v49  ;;  %v1602_v41 = vpop.permute.xlu0 %1601 }
 0xab2   : > { %2054 = vmatmul.mubr.msk.bf16.vlgmr.msra.gmra.mrb[24].mxu1 %vm493_vm3, %v1493_v47  ;;  %v1604_v0 = vpop.permute.xlu1 %1603  ;;  %v1685_v1 = vsel %vm366_vm1, %v2630_v56, %v1602_v41 }
 0xab3   : > { %2057 = vmatprep.mubr.msk.bf16.mxu1 %vm493_vm3, %v1494_v50  ;;  %v1686_v54 = vsel %vm366_vm1, %v2634_v58, %v1604_v0 }
 0xab5   : > { %v1606_v29 = vpop.permute.xlu0 %1605 }
 0xab6   : > { %v1608_v31 = vpop.permute.xlu1 %1607  ;;  %v1687_v56 = vsel %vm366_vm1, %v2628_v55, %v1606_v29 }
 0xab7   : > { %v1688_v9 = vsel %vm366_vm1, %v2632_v57, %v1608_v31 }
 0xab9   : > { %v1626_v4 = vpop.permute.xlu0 %1625 }
 0xaba   : > { %2058 = vmatmul.mubr.msk.bf16.gmra.mrb[28].mxu1 %vm493_vm3, %v1495_v38  ;;  %v1628_v32 = vpop.permute.xlu1 %1627  ;;  %v1689_v53 = vsel %vm411_vm2, %v1681_v51, %v1626_v4 }
 0xabb   : > { %v1690_v19 = vsel %vm411_vm2, %v1682_v17, %v1628_v32 }
 0xabd   : > { %v1630_v33 = vpop.permute.xlu0 %1629 }
 0xabe   : > { %v1632_v8 = vpop.permute.xlu1 %1631  ;;  %v1691_v15 = vsel %vm411_vm2, %v1683_v45, %v1630_v33 }
 0xabf   : > { %v1692_v12 = vsel %vm411_vm2, %v1684_v26, %v1632_v8 }
 0xac1   : > { %v1634_v37 = vpop.permute.xlu0 %1633 }
 0xac2   : > { %v1636_v35 = vpop.permute.xlu1 %1635  ;;  %v1693_v2 = vsel %vm411_vm2, %v1685_v1, %v1634_v37 }
 0xac3   : > { %v1694_v5 = vsel %vm411_vm2, %v1686_v54, %v1636_v35 }
 0xac5   : > { %v1638_v60 = vpop.permute.xlu0 %1637 }
 0xac6   : > { %v1640_v40 = vpop.permute.xlu1 %1639  ;;  %v1695_v58 = vsel %vm411_vm2, %v1687_v56, %v1638_v60 }
 0xac7   : > { %v1696_v55 = vsel %vm411_vm2, %v1688_v9, %v1640_v40 }
 0xb85   : > { %v2055_v42 = vpop.f32.mrb[24].mxu1 }
 0xb86   : > { %1661 = vrot.lane.b32.xlu0 %v2055_v42, %s2350_s8  ;;  %v1554_v16 = vpop.f32.mrb[25].mxu1 }
 0xb87   : > { %v2056_v36 = vpop.f32.mrb[26].mxu1 }
 0xb88   : > { %1663 = vrot.lane.b32.xlu1 %v2056_v36, %s2350_s8  ;;  %v1557_v61 = vpop.f32.mrb[27].mxu1 }
 0xb8a   : > { %1657 = vrot.lane.b32.xlu0 %v1554_v16, %s2350_s8 }
 0xb8c   : > { %1659 = vrot.lane.b32.xlu1 %v1557_v61, %s2350_s8 }
 0xb8d   : > { %v2059_v62 = vpop.f32.mrb[28].mxu1 }
 0xb8e   : > { %v1570_v20 = vpop.f32.mrb[29].mxu1 }
 0xb8f   : > { %1665 = vrot.lane.b32.xlu0 %v1570_v20, %s2350_s8  ;;  %v2060_v21 = vpop.f32.mrb[30].mxu1 }
 0xb90   : > { %v1573_v23 = vpop.f32.mrb[31].mxu1 }
 0xb91   : > { %1667 = vrot.lane.b32.xlu1 %v1573_v23, %s2350_s8 }
 0xb93   : > { %1669 = vrot.lane.b32.xlu0 %v2059_v62, %s2350_s8 }
 0xb95   : > { %1671 = vrot.lane.b32.xlu1 %v2060_v21, %s2350_s8 }
 0xbf8   : > { %v1662_v25 = vpop.permute.xlu0 %1661 }
 0xbf9   : > { %v1700_v11 = vsel %vm1697_vm4, %v1691_v15, %v1662_v25 }
 0xbfa   : > { %1708 = vst.msk [vmem:[%s2962_s11 + $0x10] sm:$0xff] %vm256_vm0, %v1700_v11  ;;  %v1664_v7 = vpop.permute.xlu1 %1663 }
 0xbfb   : > { %v1701_v13 = vsel %vm1697_vm4, %v1692_v12, %v1664_v7 }
 0xbfc   : > { %1709 = vst.msk [vmem:[%s2962_s11 + $0x18] sm:$0xff] %vm256_vm0, %v1701_v13  ;;  %v1658_v14 = vpop.permute.xlu0 %1657 }
 0xbfd   : > { %v1698_v18 = vsel %vm1697_vm4, %v1689_v53, %v1658_v14 }
 0xbfe   : > { %1706 = vst.msk [vmem:[%s2962_s11] sm:$0xff] %vm256_vm0, %v1698_v18  ;;  %v1660_v52 = vpop.permute.xlu1 %1659 }
 0xbff   : > { %v1699_v63 = vsel %vm1697_vm4, %v1690_v19, %v1660_v52 }
 0xc00   : > { %1707 = vst.msk [vmem:[%s2962_s11 + $0x8] sm:$0xff] %vm256_vm0, %v1699_v63 }
 0xc01   : > { %v1666_v6 = vpop.permute.xlu0 %1665 }
 0xc02   : > { %v1702_v3 = vsel %vm1697_vm4, %v1693_v2, %v1666_v6 }
 0xc03   : > { %1710 = vst.msk [vmem:[%s2962_s11 + $0x20] sm:$0xff] %vm256_vm0, %v1702_v3  ;;  %v1668_v10 = vpop.permute.xlu1 %1667 }
 0xc04   : > { %v1703_v28 = vsel %vm1697_vm4, %v1694_v5, %v1668_v10 }
 0xc05   : > { %1711 = vst.msk [vmem:[%s2962_s11 + $0x28] sm:$0xff] %vm256_vm0, %v1703_v28  ;;  %v1670_v43 = vpop.permute.xlu0 %1669 }
 0xc06   : > { %v1704_v34 = vsel %vm1697_vm4, %v1695_v58, %v1670_v43 }
 0xc07   : > { %1712 = vst.msk [vmem:[%s2962_s11 + $0x30] sm:$0xff] %vm256_vm0, %v1704_v34  ;;  %v1672_v46 = vpop.permute.xlu1 %1671 }
 0xc08   : > { %v1705_v44 = vsel %vm1697_vm4, %v1696_v55, %v1672_v46 }
 0xc09   : > { %1713 = vst.msk [vmem:[%s2962_s11 + $0x38] sm:$0xff] %vm256_vm0, %v1705_v44 }
 0xc0a   : > { %2286 = shalt.err (!%p2283_p3)
}
 0xc0b   : > { %s2287_s5 = scalar_lea.hbm %s3004_s22, 1024  ;;  %s2291_s8 = scalar_lea.hbm %s3062_s4, 2048 }
 0xc0c   : > { %p2288_p4 = scmp.ne.s32.totalorder %s3004_s22, %s2287_s5  ;;  %p2292_p9 = scmp.lt.u32.totalorder %s3004_s22, %s3062_s4 }
 0xc0d   : > { %p2293_p10 = scmp.lt.u32.totalorder %s2291_s8, %s2287_s5  ;;  %p2295_p12 = scmp.lt.u32.totalorder %s2287_s5, %s3004_s22 }
 0xc0e   : > { %p2289_p7 = pnand %p2288_p4, %p2416_p5 }
 0xc0f   : > { %p2294_p11 = por %p2293_p10, %p2292_p9 }
 0xc10   : > { %p2290_p8 = pneg %p2289_p7 }
 0xc11   : > { %p2296_p13 = por %p2295_p12, %p2294_p11 }
 0xc13   : > { %p2297_p0 = pnand %p2296_p13, %p2290_p8 }
 0xc15   : > { %2300 = shalt.err (!%p2297_p0)
}
 0xc16   : > { %s2352_s11 = smov 128  }
 0xc17   : > { %2077 = dma.vmem_to_hbm [thread:$0]  (%p2416_p5), %s3009_s14, 1024, %s3004_s22, %s3016_s23, %s2352_s11, %s2352_s11, %s2338_s13  }
 0xc18 PF: > { %p2083_p1 = scmp.ge.s32.totalorder %s2335_s18, 2  ;;  %s1743_s12 = sand.u32 1, %s2323_s15  }
 0xc19   : > { %s1744_s20 = scalar_lea.sflag [#allocation3], %s1743_s12 }
 0xc1a   : > { %p2080_p2 = pnand %p2083_p1, %p2420_p6 }
 0xc1c   : > { %2318 = dma.done.wait (!%p2080_p2), %s1744_s20, 1024  }
 0xc1d   : > { %2320 = vsyncadd (!%p2080_p2), %s1744_s20, 4294966272  ;;  %p14_p3 = scmp.ge.s32.totalorder %s2403_s21, 4   ;;  %s3065_s15 = smov %s2327_s16 }
 0xc1e   : > { %s3066_s16 = smov %s2331_s17  ;;  %s3067_s17 = smov %s2414_s24 }
 0xc1f   : > { %s3068_s18 = smov %s2403_s21  ;;  %16 = sbr.rel (!%p14_p3) target bundleno = 3 (0x3), region = 71 }
 0xc26   :  { %1749 = vsyncpa [#allocation3], 1 }
 0xc27   :  { %1751 = vsyncpa [#allocation3 + $0x1], 1 }

</bundles_post_ra>
